<compile_context>
chip_gen: v7x
topology: tpu7x:2x2x1
jax: 0.10.0
libtpu: 0.0.40
codegen_flags: <defaults>
</compile_context>

<pallas_src>
import functools

import jax
import jax.numpy as jnp
from jax.experimental import pallas as pl
from jax.experimental.pallas import tpu as pltpu


# ----------------------------- Pallas kernel --------------------------------
def seq2seq_kernel(src_ref,                     # (S, B, D_in)   time-major
                   w_x_e_ref, b_e_ref,          # encoder input proj (D_in, 4H), (1, 4H)
                   w_hh_e_ref,                  # encoder recurrent  (H, 4H)
                   w0_dec_ref, b0_dec_ref,      # step-0 folded input path (D_in, 4H), (1, 4H)
                   w_hh_d_ref,                  # decoder recurrent  (H, 4H)
                   w_eff_ref, b_eff_ref,        # folded feedback recurrence (H, 4H), (1, 4H)
                   w_out_ref, b_out_ref,        # output head, lane-padded (H, D_pad), (1, D_pad)
                   out_ref,                     # (T, B, D_pad)
                   *, hidden, tgt_len):
    S, B, D_in = src_ref.shape
    H = hidden
    G = 4 * H
    D_pad = out_ref.shape[-1]

    src = src_ref[...]                                           # (S, B, D_in)

    # ---- off-critical-path precompute (one wide MXU push each) -------------
    # Encoder x-path for ALL timesteps; b_e folded in here (one broadcast total).
    xg = (jnp.dot(src.reshape(S * B, D_in), w_x_e_ref[...],
                  preferred_element_type=jnp.float32)
          + b_e_ref[...])                                        # (S*B, 4H)
    # Decoder step-0 input gates: project() folded into w_ih_d on the host, so
    # this depends only on src and overlaps with the encoder recurrence.
    gx0 = (jnp.dot(src[S - 1], w0_dec_ref[...],
                   preferred_element_type=jnp.float32)
           + b0_dec_ref[...])                                    # (B, 4H)

    def gates_to_hc(gates, c):
        """PyTorch gate order (i, f, g, o); 2 full-vreg EUP passes per step."""
        sg = jax.nn.sigmoid(gates)                               # (B, 4H)
        tg = jnp.tanh(gates)                                     # (B, 4H)
        i = sg[:, 0 * H:1 * H]
        f = sg[:, 1 * H:2 * H]
        g = tg[:, 2 * H:3 * H]
        o = sg[:, 3 * H:4 * H]
        c_new = f * c + i * g
        h_new = o * jnp.tanh(c_new)
        return h_new, c_new

    # ---- encoder recurrence: one narrow (B,H)@(H,4H) matmul per step --------
    w_hh_e = w_hh_e_ref[...]
    h = jnp.zeros((B, H), jnp.float32)
    c = jnp.zeros((B, H), jnp.float32)
    for t in range(S):                                           # static, fully unrolled
        gates = xg[t * B:(t + 1) * B, :] + jnp.dot(
            h, w_hh_e, preferred_element_type=jnp.float32)
        h, c = gates_to_hc(gates, c)

    # ---- decoder step 0: handoff is a single h @ w_hh_d matmul --------------
    gates0 = gx0 + jnp.dot(h, w_hh_d_ref[...],
                           preferred_element_type=jnp.float32)
    h, c = gates_to_hc(gates0, c)
    hs = [h]

    # ---- decoder steps 1..T-1: folded feedback (gates depend only on h) -----
    # x_t = h_{t-1} @ w_out + b_out  =>  gates_t = h_{t-1} @ w_eff + b_eff.
    w_eff = w_eff_ref[...]
    b_eff = jnp.broadcast_to(b_eff_ref[...], (B, G))             # hoisted broadcast
    for _ in range(1, tgt_len):                                  # static, fully unrolled
        gates = jnp.dot(h, w_eff, preferred_element_type=jnp.float32) + b_eff
        h, c = gates_to_hc(gates, c)
        hs.append(h)

    # ---- batched output head + single lane-dense slab store -----------------
    h_all = jnp.concatenate(hs, axis=0)                          # (T*B, H)
    out = (jnp.dot(h_all, w_out_ref[...],
                   preferred_element_type=jnp.float32)
           + b_out_ref[...])                                     # (T*B, D_pad)
    out_ref[...] = out.reshape(tgt_len, B, D_pad).astype(out_ref.dtype)


# ------------------------------ host wrapper ---------------------------------
def _prep_kernel_weights(params):
    """Fold / pad weights once on the host (f32 throughout)."""
    H = params["w_hh_e"].shape[0]
    D_out = params["w_out"].shape[1]
    d_pad = ((D_out + 127) // 128) * 128

    # project() folded into the decoder's step-0 input path.
    w0_dec = params["w_proj"] @ params["w_ih_d"]                 # (D_in, 4H)
    b0_dec = params["b_proj"] @ params["w_ih_d"] + params["b_d"] # (1, 4H)
    # Folded decoder feedback recurrence: x_t = h_{t-1}@w_out + b_out for t >= 1.
    w_eff = params["w_out"] @ params["w_ih_d"] + params["w_hh_d"]  # (H, 4H)
    b_eff = params["b_out"] @ params["w_ih_d"] + params["b_d"]     # (1, 4H)
    # Lane-pad the output head so the single slab store is a full 128-lane tile.
    w_out_pad = jnp.zeros((H, d_pad), jnp.float32).at[:, :D_out].set(params["w_out"])
    b_out_pad = jnp.zeros((1, d_pad), jnp.float32).at[:, :D_out].set(params["b_out"])

    return {
        "w_x_e": params["w_ih_e"], "b_e": params["b_e"], "w_hh_e": params["w_hh_e"],
        "w0_dec": w0_dec, "b0_dec": b0_dec, "w_hh_d": params["w_hh_d"],
        "w_eff": w_eff, "b_eff": b_eff,
        "w_out_pad": w_out_pad, "b_out_pad": b_out_pad,
        "d_pad": d_pad, "d_out": D_out, "hidden": H,
    }


def seq2seq_forward(src, params, tgt_len):
    """src: (B, S, D_in) batch-major (PyTorch convention). Returns (B, tgt_len, D_out)."""
    B, S, D_in = src.shape
    kp = _prep_kernel_weights(params)
    H, D_out, D_pad = kp["hidden"], kp["d_out"], kp["d_pad"]

    # Time-major so each step reads a contiguous (B, D) tile.
    src_tm = jnp.transpose(src, (1, 0, 2))                       # (S, B, D_in)

    kernel = functools.partial(seq2seq_kernel, hidden=H, tgt_len=tgt_len)
    n_in = 11
    out_tm = pl.pallas_call(
        kernel,
        out_shape=jax.ShapeDtypeStruct((tgt_len, B, D_pad), jnp.float32),
        in_specs=[pl.BlockSpec(memory_space=pltpu.MemorySpace.VMEM)] * n_in,
        out_specs=pl.BlockSpec(memory_space=pltpu.MemorySpace.VMEM),
    )(src_tm,
      kp["w_x_e"], kp["b_e"], kp["w_hh_e"],
      kp["w0_dec"], kp["b0_dec"], kp["w_hh_d"],
      kp["w_eff"], kp["b_eff"],
      kp["w_out_pad"], kp["b_out_pad"])

    # back to (B, tgt_len, D_out), dropping the lane padding
    return jnp.transpose(out_tm, (1, 0, 2))[:, :, :D_out]


# ------------------------- pure-JAX reference --------------------------------
def seq2seq_reference(src, params, tgt_len):
    B, S, _ = src.shape
    H = params["w_hh_e"].shape[0]

    def lstm_step(x, h, c, w_ih, w_hh, b):
        gates = x @ w_ih + h @ w_hh + b
        i = jax.nn.sigmoid(gates[:, 0 * H:1 * H])
        f = jax.nn.sigmoid(gates[:, 1 * H:2 * H])
        g = jnp.tanh(gates[:, 2 * H:3 * H])
        o = jax.nn.sigmoid(gates[:, 3 * H:4 * H])
        c = f * c + i * g
        return o * jnp.tanh(c), c

    h = jnp.zeros((B, H), jnp.float32)
    c = jnp.zeros((B, H), jnp.float32)
    for t in range(S):
        h, c = lstm_step(src[:, t, :], h, c,
                         params["w_ih_e"], params["w_hh_e"], params["b_e"])
    dec_in = src[:, -1, :] @ params["w_proj"] + params["b_proj"]
    outs = []
    for _ in range(tgt_len):
        h, c = lstm_step(dec_in, h, c,
                         params["w_ih_d"], params["w_hh_d"], params["b_d"])
        out = h @ params["w_out"] + params["b_out"]
        outs.append(out)
        dec_in = out
    return jnp.stack(outs, axis=1)


# --------------------------------- main ---------------------------------------
def init_params(key, input_dim, hidden, output_dim):
    ks = jax.random.split(key, 12)
    s = 0.1
    # Weights stored pre-transposed for (B, D) @ (D, 4H) matmuls; biases (1, 4H).
    return {
        "w_ih_e": s * jax.random.normal(ks[0], (input_dim, 4 * hidden), jnp.float32),
        "w_hh_e": s * jax.random.normal(ks[1], (hidden, 4 * hidden), jnp.float32),
        # combined b_ih + b_hh (PyTorch has both; their sum is what enters the gates)
        "b_e":    s * jax.random.normal(ks[2], (1, 4 * hidden), jnp.float32),
        "w_proj": s * jax.random.normal(ks[3], (input_dim, output_dim), jnp.float32),
        "b_proj": s * jax.random.normal(ks[4], (1, output_dim), jnp.float32),
        "w_ih_d": s * jax.random.normal(ks[5], (output_dim, 4 * hidden), jnp.float32),
        "w_hh_d": s * jax.random.normal(ks[6], (hidden, 4 * hidden), jnp.float32),
        "b_d":    s * jax.random.normal(ks[7], (1, 4 * hidden), jnp.float32),
        "w_out":  s * jax.random.normal(ks[8], (hidden, output_dim), jnp.float32),
        "b_out":  s * jax.random.normal(ks[9], (1, output_dim), jnp.float32),
    }


if __name__ == "__main__":
    B, S, D_IN, HIDDEN, D_OUT, TGT_LEN = 8, 8, 32, 32, 32, 5

    key = jax.random.PRNGKey(0)
    k_src, k_par = jax.random.split(key)
    src = jax.random.normal(k_src, (B, S, D_IN), jnp.float32)
    params = init_params(k_par, D_IN, HIDDEN, D_OUT)

    out = seq2seq_forward(src, params, TGT_LEN)
    out = jax.block_until_ready(out)

    ref = seq2seq_reference(src, params, TGT_LEN)
    assert out.shape == (B, TGT_LEN, D_OUT), out.shape
    # Host-side weight folding (proj->step0, w_out->feedback) and the hoisted
    # x-projection reassociate f32 sums; semantics are unchanged, tolerance is
    # relaxed slightly vs. 1e-5 to absorb compounded rounding over T steps.
    assert jnp.allclose(out, ref, atol=2e-4, rtol=2e-4), "mismatch vs reference"

    print("KERNEL_OK")
</pallas_src>

<mosaic_0001>
module attributes {stable_mosaic.version = 11 : i64} {
  func.func @seq2seq_kernel(%arg0: memref<8x8x32xf32, #tpu.memory_space<vmem>>, %arg1: memref<32x128xf32, #tpu.memory_space<vmem>>, %arg2: memref<1x128xf32, #tpu.memory_space<vmem>>, %arg3: memref<32x128xf32, #tpu.memory_space<vmem>>, %arg4: memref<32x128xf32, #tpu.memory_space<vmem>>, %arg5: memref<1x128xf32, #tpu.memory_space<vmem>>, %arg6: memref<32x128xf32, #tpu.memory_space<vmem>>, %arg7: memref<32x128xf32, #tpu.memory_space<vmem>>, %arg8: memref<1x128xf32, #tpu.memory_space<vmem>>, %arg9: memref<32x128xf32, #tpu.memory_space<vmem>>, %arg10: memref<1x128xf32, #tpu.memory_space<vmem>>, %arg11: memref<5x8x128xf32, #tpu.memory_space<vmem>>) attributes {dimension_semantics = [], scalar_prefetch = 0 : i64, scratch_operands = 0 : i64, tpu.core_type = #tpu.core_type<tc>} {
    %c0 = arith.constant 0 : index
    %c0_0 = arith.constant 0 : index
    %c0_1 = arith.constant 0 : index
    %0 = vector.load %arg0[%c0, %c0_0, %c0_1] : memref<8x8x32xf32, #tpu.memory_space<vmem>>, vector<8x8x32xf32>
    %1 = vector.shape_cast %0 : vector<8x8x32xf32> to vector<64x32xf32>
    %c0_2 = arith.constant 0 : index
    %c0_3 = arith.constant 0 : index
    %2 = vector.load %arg1[%c0_2, %c0_3] : memref<32x128xf32, #tpu.memory_space<vmem>>, vector<32x128xf32>
    %cst = arith.constant dense<0.000000e+00> : vector<64x128xf32>
    %3 = tpu.matmul %1, %2, %cst {dimension_numbers = #tpu.dot_dimension_numbers<[1], [0], [0], [1], [0, 0, 1, 1], [], []>} : vector<64x32xf32>, vector<32x128xf32>, vector<64x128xf32> -> vector<64x128xf32>
    %c0_4 = arith.constant 0 : index
    %c0_5 = arith.constant 0 : index
    %4 = vector.load %arg2[%c0_4, %c0_5] : memref<1x128xf32, #tpu.memory_space<vmem>>, vector<1x128xf32>
    %5 = vector.broadcast %4 : vector<1x128xf32> to vector<64x128xf32>
    %6 = arith.addf %3, %5 : vector<64x128xf32>
    %7 = vector.extract_strided_slice %0 {offsets = [7, 0, 0], sizes = [1, 8, 32], strides = [1, 1, 1]} : vector<8x8x32xf32> to vector<1x8x32xf32>
    %8 = vector.shape_cast %7 : vector<1x8x32xf32> to vector<8x32xf32>
    %c0_6 = arith.constant 0 : index
    %c0_7 = arith.constant 0 : index
    %9 = vector.load %arg4[%c0_6, %c0_7] : memref<32x128xf32, #tpu.memory_space<vmem>>, vector<32x128xf32>
    %cst_8 = arith.constant dense<0.000000e+00> : vector<8x128xf32>
    %10 = tpu.matmul %8, %9, %cst_8 {dimension_numbers = #tpu.dot_dimension_numbers<[1], [0], [0], [1], [0, 0, 1, 1], [], []>} : vector<8x32xf32>, vector<32x128xf32>, vector<8x128xf32> -> vector<8x128xf32>
    %c0_9 = arith.constant 0 : index
    %c0_10 = arith.constant 0 : index
    %11 = vector.load %arg5[%c0_9, %c0_10] : memref<1x128xf32, #tpu.memory_space<vmem>>, vector<1x128xf32>
    %12 = vector.broadcast %11 : vector<1x128xf32> to vector<8x128xf32>
    %13 = arith.addf %10, %12 : vector<8x128xf32>
    %c0_11 = arith.constant 0 : index
    %c0_12 = arith.constant 0 : index
    %14 = vector.load %arg3[%c0_11, %c0_12] : memref<32x128xf32, #tpu.memory_space<vmem>>, vector<32x128xf32>
    %cst_13 = arith.constant 0.000000e+00 : f32
    %15 = vector.broadcast %cst_13 : f32 to vector<8x32xf32>
    %cst_14 = arith.constant 0.000000e+00 : f32
    %16 = vector.broadcast %cst_14 : f32 to vector<8x32xf32>
    %17 = vector.extract_strided_slice %6 {offsets = [0, 0], sizes = [8, 128], strides = [1, 1]} : vector<64x128xf32> to vector<8x128xf32>
    %cst_15 = arith.constant dense<0.000000e+00> : vector<8x128xf32>
    %18 = tpu.matmul %15, %14, %cst_15 {dimension_numbers = #tpu.dot_dimension_numbers<[1], [0], [0], [1], [0, 0, 1, 1], [], []>} : vector<8x32xf32>, vector<32x128xf32>, vector<8x128xf32> -> vector<8x128xf32>
    %19 = arith.addf %17, %18 : vector<8x128xf32>
    %20 = arith.negf %19 : vector<8x128xf32>
    %21 = math.exp %20 : vector<8x128xf32>
    %cst_16 = arith.constant 1.000000e+00 : f32
    %22 = vector.broadcast %cst_16 : f32 to vector<8x128xf32>
    %23 = arith.addf %22, %21 : vector<8x128xf32>
    %24 = arith.divf %22, %23 : vector<8x128xf32>
    %25 = math.tanh %19 : vector<8x128xf32>
    %26 = vector.extract_strided_slice %24 {offsets = [0, 0], sizes = [8, 32], strides = [1, 1]} : vector<8x128xf32> to vector<8x32xf32>
    %27 = vector.extract_strided_slice %24 {offsets = [0, 32], sizes = [8, 32], strides = [1, 1]} : vector<8x128xf32> to vector<8x32xf32>
    %28 = vector.extract_strided_slice %25 {offsets = [0, 64], sizes = [8, 32], strides = [1, 1]} : vector<8x128xf32> to vector<8x32xf32>
    %29 = vector.extract_strided_slice %24 {offsets = [0, 96], sizes = [8, 32], strides = [1, 1]} : vector<8x128xf32> to vector<8x32xf32>
    %30 = arith.mulf %27, %16 : vector<8x32xf32>
    %31 = arith.mulf %26, %28 : vector<8x32xf32>
    %32 = arith.addf %30, %31 : vector<8x32xf32>
    %33 = math.tanh %32 : vector<8x32xf32>
    %34 = arith.mulf %29, %33 : vector<8x32xf32>
    %35 = vector.extract_strided_slice %6 {offsets = [8, 0], sizes = [8, 128], strides = [1, 1]} : vector<64x128xf32> to vector<8x128xf32>
    %cst_17 = arith.constant dense<0.000000e+00> : vector<8x128xf32>
    %36 = tpu.matmul %34, %14, %cst_17 {dimension_numbers = #tpu.dot_dimension_numbers<[1], [0], [0], [1], [0, 0, 1, 1], [], []>} : vector<8x32xf32>, vector<32x128xf32>, vector<8x128xf32> -> vector<8x128xf32>
    %37 = arith.addf %35, %36 : vector<8x128xf32>
    %38 = arith.negf %37 : vector<8x128xf32>
    %39 = math.exp %38 : vector<8x128xf32>
    %cst_18 = arith.constant 1.000000e+00 : f32
    %40 = vector.broadcast %cst_18 : f32 to vector<8x128xf32>
    %41 = arith.addf %40, %39 : vector<8x128xf32>
    %42 = arith.divf %40, %41 : vector<8x128xf32>
    %43 = math.tanh %37 : vector<8x128xf32>
    %44 = vector.extract_strided_slice %42 {offsets = [0, 0], sizes = [8, 32], strides = [1, 1]} : vector<8x128xf32> to vector<8x32xf32>
    %45 = vector.extract_strided_slice %42 {offsets = [0, 32], sizes = [8, 32], strides = [1, 1]} : vector<8x128xf32> to vector<8x32xf32>
    %46 = vector.extract_strided_slice %43 {offsets = [0, 64], sizes = [8, 32], strides = [1, 1]} : vector<8x128xf32> to vector<8x32xf32>
    %47 = vector.extract_strided_slice %42 {offsets = [0, 96], sizes = [8, 32], strides = [1, 1]} : vector<8x128xf32> to vector<8x32xf32>
    %48 = arith.mulf %45, %32 : vector<8x32xf32>
    %49 = arith.mulf %44, %46 : vector<8x32xf32>
    %50 = arith.addf %48, %49 : vector<8x32xf32>
    %51 = math.tanh %50 : vector<8x32xf32>
    %52 = arith.mulf %47, %51 : vector<8x32xf32>
    %53 = vector.extract_strided_slice %6 {offsets = [16, 0], sizes = [8, 128], strides = [1, 1]} : vector<64x128xf32> to vector<8x128xf32>
    %cst_19 = arith.constant dense<0.000000e+00> : vector<8x128xf32>
    %54 = tpu.matmul %52, %14, %cst_19 {dimension_numbers = #tpu.dot_dimension_numbers<[1], [0], [0], [1], [0, 0, 1, 1], [], []>} : vector<8x32xf32>, vector<32x128xf32>, vector<8x128xf32> -> vector<8x128xf32>
    %55 = arith.addf %53, %54 : vector<8x128xf32>
    %56 = arith.negf %55 : vector<8x128xf32>
    %57 = math.exp %56 : vector<8x128xf32>
    %cst_20 = arith.constant 1.000000e+00 : f32
    %58 = vector.broadcast %cst_20 : f32 to vector<8x128xf32>
    %59 = arith.addf %58, %57 : vector<8x128xf32>
    %60 = arith.divf %58, %59 : vector<8x128xf32>
    %61 = math.tanh %55 : vector<8x128xf32>
    %62 = vector.extract_strided_slice %60 {offsets = [0, 0], sizes = [8, 32], strides = [1, 1]} : vector<8x128xf32> to vector<8x32xf32>
    %63 = vector.extract_strided_slice %60 {offsets = [0, 32], sizes = [8, 32], strides = [1, 1]} : vector<8x128xf32> to vector<8x32xf32>
    %64 = vector.extract_strided_slice %61 {offsets = [0, 64], sizes = [8, 32], strides = [1, 1]} : vector<8x128xf32> to vector<8x32xf32>
    %65 = vector.extract_strided_slice %60 {offsets = [0, 96], sizes = [8, 32], strides = [1, 1]} : vector<8x128xf32> to vector<8x32xf32>
    %66 = arith.mulf %63, %50 : vector<8x32xf32>
    %67 = arith.mulf %62, %64 : vector<8x32xf32>
    %68 = arith.addf %66, %67 : vector<8x32xf32>
    %69 = math.tanh %68 : vector<8x32xf32>
    %70 = arith.mulf %65, %69 : vector<8x32xf32>
    %71 = vector.extract_strided_slice %6 {offsets = [24, 0], sizes = [8, 128], strides = [1, 1]} : vector<64x128xf32> to vector<8x128xf32>
    %cst_21 = arith.constant dense<0.000000e+00> : vector<8x128xf32>
    %72 = tpu.matmul %70, %14, %cst_21 {dimension_numbers = #tpu.dot_dimension_numbers<[1], [0], [0], [1], [0, 0, 1, 1], [], []>} : vector<8x32xf32>, vector<32x128xf32>, vector<8x128xf32> -> vector<8x128xf32>
    %73 = arith.addf %71, %72 : vector<8x128xf32>
    %74 = arith.negf %73 : vector<8x128xf32>
    %75 = math.exp %74 : vector<8x128xf32>
    %cst_22 = arith.constant 1.000000e+00 : f32
    %76 = vector.broadcast %cst_22 : f32 to vector<8x128xf32>
    %77 = arith.addf %76, %75 : vector<8x128xf32>
    %78 = arith.divf %76, %77 : vector<8x128xf32>
    %79 = math.tanh %73 : vector<8x128xf32>
    %80 = vector.extract_strided_slice %78 {offsets = [0, 0], sizes = [8, 32], strides = [1, 1]} : vector<8x128xf32> to vector<8x32xf32>
    %81 = vector.extract_strided_slice %78 {offsets = [0, 32], sizes = [8, 32], strides = [1, 1]} : vector<8x128xf32> to vector<8x32xf32>
    %82 = vector.extract_strided_slice %79 {offsets = [0, 64], sizes = [8, 32], strides = [1, 1]} : vector<8x128xf32> to vector<8x32xf32>
    %83 = vector.extract_strided_slice %78 {offsets = [0, 96], sizes = [8, 32], strides = [1, 1]} : vector<8x128xf32> to vector<8x32xf32>
    %84 = arith.mulf %81, %68 : vector<8x32xf32>
    %85 = arith.mulf %80, %82 : vector<8x32xf32>
    %86 = arith.addf %84, %85 : vector<8x32xf32>
    %87 = math.tanh %86 : vector<8x32xf32>
    %88 = arith.mulf %83, %87 : vector<8x32xf32>
    %89 = vector.extract_strided_slice %6 {offsets = [32, 0], sizes = [8, 128], strides = [1, 1]} : vector<64x128xf32> to vector<8x128xf32>
    %cst_23 = arith.constant dense<0.000000e+00> : vector<8x128xf32>
    %90 = tpu.matmul %88, %14, %cst_23 {dimension_numbers = #tpu.dot_dimension_numbers<[1], [0], [0], [1], [0, 0, 1, 1], [], []>} : vector<8x32xf32>, vector<32x128xf32>, vector<8x128xf32> -> vector<8x128xf32>
    %91 = arith.addf %89, %90 : vector<8x128xf32>
    %92 = arith.negf %91 : vector<8x128xf32>
    %93 = math.exp %92 : vector<8x128xf32>
    %cst_24 = arith.constant 1.000000e+00 : f32
    %94 = vector.broadcast %cst_24 : f32 to vector<8x128xf32>
    %95 = arith.addf %94, %93 : vector<8x128xf32>
    %96 = arith.divf %94, %95 : vector<8x128xf32>
    %97 = math.tanh %91 : vector<8x128xf32>
    %98 = vector.extract_strided_slice %96 {offsets = [0, 0], sizes = [8, 32], strides = [1, 1]} : vector<8x128xf32> to vector<8x32xf32>
    %99 = vector.extract_strided_slice %96 {offsets = [0, 32], sizes = [8, 32], strides = [1, 1]} : vector<8x128xf32> to vector<8x32xf32>
    %100 = vector.extract_strided_slice %97 {offsets = [0, 64], sizes = [8, 32], strides = [1, 1]} : vector<8x128xf32> to vector<8x32xf32>
    %101 = vector.extract_strided_slice %96 {offsets = [0, 96], sizes = [8, 32], strides = [1, 1]} : vector<8x128xf32> to vector<8x32xf32>
    %102 = arith.mulf %99, %86 : vector<8x32xf32>
    %103 = arith.mulf %98, %100 : vector<8x32xf32>
    %104 = arith.addf %102, %103 : vector<8x32xf32>
    %105 = math.tanh %104 : vector<8x32xf32>
    %106 = arith.mulf %101, %105 : vector<8x32xf32>
    %107 = vector.extract_strided_slice %6 {offsets = [40, 0], sizes = [8, 128], strides = [1, 1]} : vector<64x128xf32> to vector<8x128xf32>
    %cst_25 = arith.constant dense<0.000000e+00> : vector<8x128xf32>
    %108 = tpu.matmul %106, %14, %cst_25 {dimension_numbers = #tpu.dot_dimension_numbers<[1], [0], [0], [1], [0, 0, 1, 1], [], []>} : vector<8x32xf32>, vector<32x128xf32>, vector<8x128xf32> -> vector<8x128xf32>
    %109 = arith.addf %107, %108 : vector<8x128xf32>
    %110 = arith.negf %109 : vector<8x128xf32>
    %111 = math.exp %110 : vector<8x128xf32>
    %cst_26 = arith.constant 1.000000e+00 : f32
    %112 = vector.broadcast %cst_26 : f32 to vector<8x128xf32>
    %113 = arith.addf %112, %111 : vector<8x128xf32>
    %114 = arith.divf %112, %113 : vector<8x128xf32>
    %115 = math.tanh %109 : vector<8x128xf32>
    %116 = vector.extract_strided_slice %114 {offsets = [0, 0], sizes = [8, 32], strides = [1, 1]} : vector<8x128xf32> to vector<8x32xf32>
    %117 = vector.extract_strided_slice %114 {offsets = [0, 32], sizes = [8, 32], strides = [1, 1]} : vector<8x128xf32> to vector<8x32xf32>
    %118 = vector.extract_strided_slice %115 {offsets = [0, 64], sizes = [8, 32], strides = [1, 1]} : vector<8x128xf32> to vector<8x32xf32>
    %119 = vector.extract_strided_slice %114 {offsets = [0, 96], sizes = [8, 32], strides = [1, 1]} : vector<8x128xf32> to vector<8x32xf32>
    %120 = arith.mulf %117, %104 : vector<8x32xf32>
    %121 = arith.mulf %116, %118 : vector<8x32xf32>
    %122 = arith.addf %120, %121 : vector<8x32xf32>
    %123 = math.tanh %122 : vector<8x32xf32>
    %124 = arith.mulf %119, %123 : vector<8x32xf32>
    %125 = vector.extract_strided_slice %6 {offsets = [48, 0], sizes = [8, 128], strides = [1, 1]} : vector<64x128xf32> to vector<8x128xf32>
    %cst_27 = arith.constant dense<0.000000e+00> : vector<8x128xf32>
    %126 = tpu.matmul %124, %14, %cst_27 {dimension_numbers = #tpu.dot_dimension_numbers<[1], [0], [0], [1], [0, 0, 1, 1], [], []>} : vector<8x32xf32>, vector<32x128xf32>, vector<8x128xf32> -> vector<8x128xf32>
    %127 = arith.addf %125, %126 : vector<8x128xf32>
    %128 = arith.negf %127 : vector<8x128xf32>
    %129 = math.exp %128 : vector<8x128xf32>
    %cst_28 = arith.constant 1.000000e+00 : f32
    %130 = vector.broadcast %cst_28 : f32 to vector<8x128xf32>
    %131 = arith.addf %130, %129 : vector<8x128xf32>
    %132 = arith.divf %130, %131 : vector<8x128xf32>
    %133 = math.tanh %127 : vector<8x128xf32>
    %134 = vector.extract_strided_slice %132 {offsets = [0, 0], sizes = [8, 32], strides = [1, 1]} : vector<8x128xf32> to vector<8x32xf32>
    %135 = vector.extract_strided_slice %132 {offsets = [0, 32], sizes = [8, 32], strides = [1, 1]} : vector<8x128xf32> to vector<8x32xf32>
    %136 = vector.extract_strided_slice %133 {offsets = [0, 64], sizes = [8, 32], strides = [1, 1]} : vector<8x128xf32> to vector<8x32xf32>
    %137 = vector.extract_strided_slice %132 {offsets = [0, 96], sizes = [8, 32], strides = [1, 1]} : vector<8x128xf32> to vector<8x32xf32>
    %138 = arith.mulf %135, %122 : vector<8x32xf32>
    %139 = arith.mulf %134, %136 : vector<8x32xf32>
    %140 = arith.addf %138, %139 : vector<8x32xf32>
    %141 = math.tanh %140 : vector<8x32xf32>
    %142 = arith.mulf %137, %141 : vector<8x32xf32>
    %143 = vector.extract_strided_slice %6 {offsets = [56, 0], sizes = [8, 128], strides = [1, 1]} : vector<64x128xf32> to vector<8x128xf32>
    %cst_29 = arith.constant dense<0.000000e+00> : vector<8x128xf32>
    %144 = tpu.matmul %142, %14, %cst_29 {dimension_numbers = #tpu.dot_dimension_numbers<[1], [0], [0], [1], [0, 0, 1, 1], [], []>} : vector<8x32xf32>, vector<32x128xf32>, vector<8x128xf32> -> vector<8x128xf32>
    %145 = arith.addf %143, %144 : vector<8x128xf32>
    %146 = arith.negf %145 : vector<8x128xf32>
    %147 = math.exp %146 : vector<8x128xf32>
    %cst_30 = arith.constant 1.000000e+00 : f32
    %148 = vector.broadcast %cst_30 : f32 to vector<8x128xf32>
    %149 = arith.addf %148, %147 : vector<8x128xf32>
    %150 = arith.divf %148, %149 : vector<8x128xf32>
    %151 = math.tanh %145 : vector<8x128xf32>
    %152 = vector.extract_strided_slice %150 {offsets = [0, 0], sizes = [8, 32], strides = [1, 1]} : vector<8x128xf32> to vector<8x32xf32>
    %153 = vector.extract_strided_slice %150 {offsets = [0, 32], sizes = [8, 32], strides = [1, 1]} : vector<8x128xf32> to vector<8x32xf32>
    %154 = vector.extract_strided_slice %151 {offsets = [0, 64], sizes = [8, 32], strides = [1, 1]} : vector<8x128xf32> to vector<8x32xf32>
    %155 = vector.extract_strided_slice %150 {offsets = [0, 96], sizes = [8, 32], strides = [1, 1]} : vector<8x128xf32> to vector<8x32xf32>
    %156 = arith.mulf %153, %140 : vector<8x32xf32>
    %157 = arith.mulf %152, %154 : vector<8x32xf32>
    %158 = arith.addf %156, %157 : vector<8x32xf32>
    %159 = math.tanh %158 : vector<8x32xf32>
    %160 = arith.mulf %155, %159 : vector<8x32xf32>
    %c0_31 = arith.constant 0 : index
    %c0_32 = arith.constant 0 : index
    %161 = vector.load %arg6[%c0_31, %c0_32] : memref<32x128xf32, #tpu.memory_space<vmem>>, vector<32x128xf32>
    %cst_33 = arith.constant dense<0.000000e+00> : vector<8x128xf32>
    %162 = tpu.matmul %160, %161, %cst_33 {dimension_numbers = #tpu.dot_dimension_numbers<[1], [0], [0], [1], [0, 0, 1, 1], [], []>} : vector<8x32xf32>, vector<32x128xf32>, vector<8x128xf32> -> vector<8x128xf32>
    %163 = arith.addf %13, %162 : vector<8x128xf32>
    %164 = arith.negf %163 : vector<8x128xf32>
    %165 = math.exp %164 : vector<8x128xf32>
    %cst_34 = arith.constant 1.000000e+00 : f32
    %166 = vector.broadcast %cst_34 : f32 to vector<8x128xf32>
    %167 = arith.addf %166, %165 : vector<8x128xf32>
    %168 = arith.divf %166, %167 : vector<8x128xf32>
    %169 = math.tanh %163 : vector<8x128xf32>
    %170 = vector.extract_strided_slice %168 {offsets = [0, 0], sizes = [8, 32], strides = [1, 1]} : vector<8x128xf32> to vector<8x32xf32>
    %171 = vector.extract_strided_slice %168 {offsets = [0, 32], sizes = [8, 32], strides = [1, 1]} : vector<8x128xf32> to vector<8x32xf32>
    %172 = vector.extract_strided_slice %169 {offsets = [0, 64], sizes = [8, 32], strides = [1, 1]} : vector<8x128xf32> to vector<8x32xf32>
    %173 = vector.extract_strided_slice %168 {offsets = [0, 96], sizes = [8, 32], strides = [1, 1]} : vector<8x128xf32> to vector<8x32xf32>
    %174 = arith.mulf %171, %158 : vector<8x32xf32>
    %175 = arith.mulf %170, %172 : vector<8x32xf32>
    %176 = arith.addf %174, %175 : vector<8x32xf32>
    %177 = math.tanh %176 : vector<8x32xf32>
    %178 = arith.mulf %173, %177 : vector<8x32xf32>
    %c0_35 = arith.constant 0 : index
    %c0_36 = arith.constant 0 : index
    %179 = vector.load %arg7[%c0_35, %c0_36] : memref<32x128xf32, #tpu.memory_space<vmem>>, vector<32x128xf32>
    %c0_37 = arith.constant 0 : index
    %c0_38 = arith.constant 0 : index
    %180 = vector.load %arg8[%c0_37, %c0_38] : memref<1x128xf32, #tpu.memory_space<vmem>>, vector<1x128xf32>
    %181 = vector.shape_cast %180 : vector<1x128xf32> to vector<1x128xf32>
    %182 = vector.broadcast %181 : vector<1x128xf32> to vector<8x128xf32>
    %cst_39 = arith.constant dense<0.000000e+00> : vector<8x128xf32>
    %183 = tpu.matmul %178, %179, %cst_39 {dimension_numbers = #tpu.dot_dimension_numbers<[1], [0], [0], [1], [0, 0, 1, 1], [], []>} : vector<8x32xf32>, vector<32x128xf32>, vector<8x128xf32> -> vector<8x128xf32>
    %184 = arith.addf %183, %182 : vector<8x128xf32>
    %185 = arith.negf %184 : vector<8x128xf32>
    %186 = math.exp %185 : vector<8x128xf32>
    %cst_40 = arith.constant 1.000000e+00 : f32
    %187 = vector.broadcast %cst_40 : f32 to vector<8x128xf32>
    %188 = arith.addf %187, %186 : vector<8x128xf32>
    %189 = arith.divf %187, %188 : vector<8x128xf32>
    %190 = math.tanh %184 : vector<8x128xf32>
    %191 = vector.extract_strided_slice %189 {offsets = [0, 0], sizes = [8, 32], strides = [1, 1]} : vector<8x128xf32> to vector<8x32xf32>
    %192 = vector.extract_strided_slice %189 {offsets = [0, 32], sizes = [8, 32], strides = [1, 1]} : vector<8x128xf32> to vector<8x32xf32>
    %193 = vector.extract_strided_slice %190 {offsets = [0, 64], sizes = [8, 32], strides = [1, 1]} : vector<8x128xf32> to vector<8x32xf32>
    %194 = vector.extract_strided_slice %189 {offsets = [0, 96], sizes = [8, 32], strides = [1, 1]} : vector<8x128xf32> to vector<8x32xf32>
    %195 = arith.mulf %192, %176 : vector<8x32xf32>
    %196 = arith.mulf %191, %193 : vector<8x32xf32>
    %197 = arith.addf %195, %196 : vector<8x32xf32>
    %198 = math.tanh %197 : vector<8x32xf32>
    %199 = arith.mulf %194, %198 : vector<8x32xf32>
    %cst_41 = arith.constant dense<0.000000e+00> : vector<8x128xf32>
    %200 = tpu.matmul %199, %179, %cst_41 {dimension_numbers = #tpu.dot_dimension_numbers<[1], [0], [0], [1], [0, 0, 1, 1], [], []>} : vector<8x32xf32>, vector<32x128xf32>, vector<8x128xf32> -> vector<8x128xf32>
    %201 = arith.addf %200, %182 : vector<8x128xf32>
    %202 = arith.negf %201 : vector<8x128xf32>
    %203 = math.exp %202 : vector<8x128xf32>
    %cst_42 = arith.constant 1.000000e+00 : f32
    %204 = vector.broadcast %cst_42 : f32 to vector<8x128xf32>
    %205 = arith.addf %204, %203 : vector<8x128xf32>
    %206 = arith.divf %204, %205 : vector<8x128xf32>
    %207 = math.tanh %201 : vector<8x128xf32>
    %208 = vector.extract_strided_slice %206 {offsets = [0, 0], sizes = [8, 32], strides = [1, 1]} : vector<8x128xf32> to vector<8x32xf32>
    %209 = vector.extract_strided_slice %206 {offsets = [0, 32], sizes = [8, 32], strides = [1, 1]} : vector<8x128xf32> to vector<8x32xf32>
    %210 = vector.extract_strided_slice %207 {offsets = [0, 64], sizes = [8, 32], strides = [1, 1]} : vector<8x128xf32> to vector<8x32xf32>
    %211 = vector.extract_strided_slice %206 {offsets = [0, 96], sizes = [8, 32], strides = [1, 1]} : vector<8x128xf32> to vector<8x32xf32>
    %212 = arith.mulf %209, %197 : vector<8x32xf32>
    %213 = arith.mulf %208, %210 : vector<8x32xf32>
    %214 = arith.addf %212, %213 : vector<8x32xf32>
    %215 = math.tanh %214 : vector<8x32xf32>
    %216 = arith.mulf %211, %215 : vector<8x32xf32>
    %cst_43 = arith.constant dense<0.000000e+00> : vector<8x128xf32>
    %217 = tpu.matmul %216, %179, %cst_43 {dimension_numbers = #tpu.dot_dimension_numbers<[1], [0], [0], [1], [0, 0, 1, 1], [], []>} : vector<8x32xf32>, vector<32x128xf32>, vector<8x128xf32> -> vector<8x128xf32>
    %218 = arith.addf %217, %182 : vector<8x128xf32>
    %219 = arith.negf %218 : vector<8x128xf32>
    %220 = math.exp %219 : vector<8x128xf32>
    %cst_44 = arith.constant 1.000000e+00 : f32
    %221 = vector.broadcast %cst_44 : f32 to vector<8x128xf32>
    %222 = arith.addf %221, %220 : vector<8x128xf32>
    %223 = arith.divf %221, %222 : vector<8x128xf32>
    %224 = math.tanh %218 : vector<8x128xf32>
    %225 = vector.extract_strided_slice %223 {offsets = [0, 0], sizes = [8, 32], strides = [1, 1]} : vector<8x128xf32> to vector<8x32xf32>
    %226 = vector.extract_strided_slice %223 {offsets = [0, 32], sizes = [8, 32], strides = [1, 1]} : vector<8x128xf32> to vector<8x32xf32>
    %227 = vector.extract_strided_slice %224 {offsets = [0, 64], sizes = [8, 32], strides = [1, 1]} : vector<8x128xf32> to vector<8x32xf32>
    %228 = vector.extract_strided_slice %223 {offsets = [0, 96], sizes = [8, 32], strides = [1, 1]} : vector<8x128xf32> to vector<8x32xf32>
    %229 = arith.mulf %226, %214 : vector<8x32xf32>
    %230 = arith.mulf %225, %227 : vector<8x32xf32>
    %231 = arith.addf %229, %230 : vector<8x32xf32>
    %232 = math.tanh %231 : vector<8x32xf32>
    %233 = arith.mulf %228, %232 : vector<8x32xf32>
    %cst_45 = arith.constant dense<0.000000e+00> : vector<8x128xf32>
    %234 = tpu.matmul %233, %179, %cst_45 {dimension_numbers = #tpu.dot_dimension_numbers<[1], [0], [0], [1], [0, 0, 1, 1], [], []>} : vector<8x32xf32>, vector<32x128xf32>, vector<8x128xf32> -> vector<8x128xf32>
    %235 = arith.addf %234, %182 : vector<8x128xf32>
    %236 = arith.negf %235 : vector<8x128xf32>
    %237 = math.exp %236 : vector<8x128xf32>
    %cst_46 = arith.constant 1.000000e+00 : f32
    %238 = vector.broadcast %cst_46 : f32 to vector<8x128xf32>
    %239 = arith.addf %238, %237 : vector<8x128xf32>
    %240 = arith.divf %238, %239 : vector<8x128xf32>
    %241 = math.tanh %235 : vector<8x128xf32>
    %242 = vector.extract_strided_slice %240 {offsets = [0, 0], sizes = [8, 32], strides = [1, 1]} : vector<8x128xf32> to vector<8x32xf32>
    %243 = vector.extract_strided_slice %240 {offsets = [0, 32], sizes = [8, 32], strides = [1, 1]} : vector<8x128xf32> to vector<8x32xf32>
    %244 = vector.extract_strided_slice %241 {offsets = [0, 64], sizes = [8, 32], strides = [1, 1]} : vector<8x128xf32> to vector<8x32xf32>
    %245 = vector.extract_strided_slice %240 {offsets = [0, 96], sizes = [8, 32], strides = [1, 1]} : vector<8x128xf32> to vector<8x32xf32>
    %246 = arith.mulf %243, %231 : vector<8x32xf32>
    %247 = arith.mulf %242, %244 : vector<8x32xf32>
    %248 = arith.addf %246, %247 : vector<8x32xf32>
    %249 = math.tanh %248 : vector<8x32xf32>
    %250 = arith.mulf %245, %249 : vector<8x32xf32>
    %251 = tpu.concatenate %178, %199, %216, %233, %250 in 0 : vector<8x32xf32>, vector<8x32xf32>, vector<8x32xf32>, vector<8x32xf32>, vector<8x32xf32> -> vector<40x32xf32>
    %c0_47 = arith.constant 0 : index
    %c0_48 = arith.constant 0 : index
    %252 = vector.load %arg9[%c0_47, %c0_48] : memref<32x128xf32, #tpu.memory_space<vmem>>, vector<32x128xf32>
    %cst_49 = arith.constant dense<0.000000e+00> : vector<40x128xf32>
    %253 = tpu.matmul %251, %252, %cst_49 {dimension_numbers = #tpu.dot_dimension_numbers<[1], [0], [0], [1], [0, 0, 1, 1], [], []>} : vector<40x32xf32>, vector<32x128xf32>, vector<40x128xf32> -> vector<40x128xf32>
    %c0_50 = arith.constant 0 : index
    %c0_51 = arith.constant 0 : index
    %254 = vector.load %arg10[%c0_50, %c0_51] : memref<1x128xf32, #tpu.memory_space<vmem>>, vector<1x128xf32>
    %255 = vector.broadcast %254 : vector<1x128xf32> to vector<40x128xf32>
    %256 = arith.addf %253, %255 : vector<40x128xf32>
    %257 = vector.shape_cast %256 : vector<40x128xf32> to vector<5x8x128xf32>
    %c0_52 = arith.constant 0 : index
    %c0_53 = arith.constant 0 : index
    %c0_54 = arith.constant 0 : index
    %258 = vector.load %arg11[%c0_52, %c0_53, %c0_54] : memref<5x8x128xf32, #tpu.memory_space<vmem>>, vector<5x8x128xf32>
    tpu.vector_store %arg11[%c0_52, %c0_53, %c0_54], %257 {strides = array<i32>} : memref<5x8x128xf32, #tpu.memory_space<vmem>>, vector<5x8x128xf32>,
    return
  }
}

</mosaic_0001>

<bundles_post_ra>
// kernel: tpu_custom_call.1
= control target key start
LH: loop header
LB: loop body
LE: loop exit
PB: predicated region body
PF: predicated region fallthrough
CT: control target
= control target key end

     0   :  { %16 = vsyncpa [#allocation3], 0  ;;  %s2979_s0 = inlined_call_operand.hbm [shape: f32[8,8,32], index: 0, kind: input, shape index: {}]   ;;  %s2980_s1 = inlined_call_operand.hbm [shape: f32[32,128], index: 1, kind: input, shape index: {}]   ;;  %s2981_s2 = inlined_call_operand.vmem [shape: f32[1,128], index: 2, kind: input, shape index: {}]   ;;  %s2982_s3 = inlined_call_operand.hbm [shape: f32[32,128], index: 3, kind: input, shape index: {}]   ;;  %s2983_s4 = inlined_call_operand.hbm [shape: f32[32,128], index: 4, kind: input, shape index: {}]   ;;  %s2984_s5 = inlined_call_operand.vmem [shape: f32[1,128], index: 5, kind: input, shape index: {}]   ;;  %s2985_s6 = inlined_call_operand.hbm [shape: f32[32,128], index: 6, kind: input, shape index: {}]   ;;  %s2986_s7 = inlined_call_operand.hbm [shape: f32[32,128], index: 7, kind: input, shape index: {}]   ;;  %s2987_s8 = inlined_call_operand.hbm [shape: f32[1,128], index: 8, kind: input, shape index: {}]   ;;  %s2988_s9 = inlined_call_operand.vmem [shape: f32[32,128], index: 9, kind: input, shape index: {}]   ;;  %s2989_s10 = inlined_call_operand.vmem [shape: f32[1,128], index: 10, kind: input, shape index: {}]   ;;  %s2990_s11 = inlined_call_operand.hbm [shape: f32[5,8,128], index: 11, kind: output, shape index: {}]  }
   0x1   :  { %17 = vsyncpa [#allocation6], 0 }
   0x2   :  { %18 = vsyncpa [#allocation9], 0 }
   0x3   :  { %19 = vsyncpa [#allocation12], 0 }
   0x4   :  { %20 = vsyncpa [#allocation4], 0  ;;  %s2543_s17 = smov [#allocation5]   ;;  %s2544_s19 = smov [#allocation8]  }
   0x5   :  { %s38_s18 = sshll.u32 %s2543_s17, 4  ;;  %s64_s20 = sshll.u32 %s2544_s19, 4  ;;  %s39_s18 = int_to_ptr.vmem [resolvable:$true] %s38_s18  ;;  %s2618_s20 = int_to_ptr.vmem [resolvable:$true] %s64_s20 }
   0x6   :  { %s2357_s23 = scalar_lea.hbm %s2980_s1, 512 }
   0x7   :  { %p2358_p0 = scmp.ne.s32.totalorder %s2980_s1, %s2357_s23  ;;  %p2361_p1 = scmp.lt.u32.totalorder %s2357_s23, %s2980_s1 }
   0x9   :  { %p2363_p2 = pnand %p2361_p1, %p2358_p0 }
   0xb   :  { %2366 = shalt.err (!%p2363_p2)
}
   0xc   :  { %s2367_s28 = scalar_lea.vmem %s39_s18, 512  ;;  %p2372_p4 = scmp.lt.s32.totalorder %s39_s18, %s39_s18 }
   0xd   :  { %p2368_p3 = scmp.ne.s32.totalorder %s39_s18, %s2367_s28  ;;  %p2373_p5 = scmp.lt.s32.totalorder %s2367_s28, %s2367_s28 }
   0xf   :  { %p2374_p6 = por %p2373_p5, %p2372_p4 }
  0x11   :  { %p2375_p7 = pnand %p2374_p6, %p2368_p3 }
  0x13   :  { %2378 = shalt.err (!%p2375_p7)
}
  0x14   :  { %s2545_s29 = smov 128   ;;  %s2546_s30 = smov 8  }
  0x15   :  { %44 = dma.hbm_to_vmem [thread:$0]  %s2980_s1, 512, %s39_s18, [#allocation6], %s2545_s29, %s2545_s29, %s2546_s30  }
  0x16   :  { %s2379_s16 = scalar_lea.hbm %s2983_s4, 512 }
  0x17   :  { %p2380_p8 = scmp.ne.s32.totalorder %s2983_s4, %s2379_s16  ;;  %p2383_p9 = scmp.lt.u32.totalorder %s2379_s16, %s2983_s4 }
  0x19   :  { %p2385_p10 = pnand %p2383_p9, %p2380_p8 }
  0x1b   :  { %2388 = shalt.err (!%p2385_p10)
}
  0x1c   :  { %s2389_s23 = scalar_lea.vmem %s2618_s20, 512  ;;  %p2394_p12 = scmp.lt.s32.totalorder %s2618_s20, %s2618_s20 }
  0x1d   :  { %p2390_p11 = scmp.ne.s32.totalorder %s2618_s20, %s2389_s23  ;;  %p2395_p13 = scmp.lt.s32.totalorder %s2389_s23, %s2389_s23 }
  0x1f   :  { %p2396_p0 = por %p2395_p13, %p2394_p12 }
  0x21   :  { %p2397_p1 = pnand %p2396_p0, %p2390_p11 }
  0x23   :  { %2400 = shalt.err (!%p2397_p1)
}
  0x24   :  { %70 = dma.hbm_to_vmem [thread:$0]  %s2983_s4, 512, %s2618_s20, [#allocation9], %s2545_s29, %s2545_s29, %s2546_s30  }
  0x25   :  { %s2547_s24 = smov [#allocation11]   ;;  %s2548_s26 = smov [#allocation2]  }
  0x26   :  { %s90_s25 = sshll.u32 %s2547_s24, 4  ;;  %s26_s27 = sshll.u32 %s2548_s26, 4  ;;  %s91_s25 = int_to_ptr.vmem [resolvable:$true] %s90_s25  ;;  %s2655_s27 = int_to_ptr.vmem [resolvable:$true] %s26_s27 }
  0x27   :  { %s2401_s13 = scalar_lea.hbm %s2986_s7, 512 }
  0x28   :  { %p2402_p2 = scmp.ne.s32.totalorder %s2986_s7, %s2401_s13  ;;  %p2405_p3 = scmp.lt.u32.totalorder %s2401_s13, %s2986_s7 }
  0x2a   :  { %p2407_p4 = pnand %p2405_p3, %p2402_p2 }
  0x2c   :  { %2410 = shalt.err (!%p2407_p4)
}
  0x2d   :  { %s2411_s4 = scalar_lea.vmem %s91_s25, 512  ;;  %p2416_p6 = scmp.lt.s32.totalorder %s91_s25, %s91_s25 }
  0x2e   :  { %p2412_p5 = scmp.ne.s32.totalorder %s91_s25, %s2411_s4  ;;  %p2417_p7 = scmp.lt.s32.totalorder %s2411_s4, %s2411_s4 }
  0x30   :  { %p2418_p8 = por %p2417_p7, %p2416_p6 }
  0x32   :  { %p2419_p9 = pnand %p2418_p8, %p2412_p5 }
  0x34   :  { %2422 = shalt.err (!%p2419_p9)
}
  0x35   :  { %96 = dma.hbm_to_vmem [thread:$0]  %s2986_s7, 512, %s91_s25, [#allocation12], %s2545_s29, %s2545_s29, %s2546_s30  }
  0x36   :  { %s2423_s23 = scalar_lea.hbm %s2979_s0, 1024 }
  0x37   :  { %p2424_p10 = scmp.ne.s32.totalorder %s2979_s0, %s2423_s23  ;;  %p2427_p11 = scmp.lt.u32.totalorder %s2423_s23, %s2979_s0 }
  0x39   :  { %p2429_p12 = pnand %p2427_p11, %p2424_p10 }
  0x3b   :  { %2432 = shalt.err (!%p2429_p12)
}
  0x3c   :  { %s2433_s28 = scalar_lea.vmem %s2655_s27, 1024  ;;  %p2438_p0 = scmp.lt.s32.totalorder %s2655_s27, %s2655_s27 }
  0x3d   :  { %p2434_p13 = scmp.ne.s32.totalorder %s2655_s27, %s2433_s28  ;;  %p2439_p1 = scmp.lt.s32.totalorder %s2433_s28, %s2433_s28 }
  0x3f   :  { %p2440_p2 = por %p2439_p1, %p2438_p0 }
  0x41   :  { %p2441_p3 = pnand %p2440_p2, %p2434_p13 }
  0x43   :  { %2444 = shalt.err (!%p2441_p3)
}
  0x44   :  { %32 = dma.hbm_to_vmem [thread:$0]  %s2979_s0, 1024, %s2655_s27, [#allocation3], %s2545_s29, %s2545_s29, %s2546_s30  }
  0x45   :  { %s2549_s12 = smov [#allocation7]   ;;  %s2550_s14 = smov [#allocation10]  }
  0x46   :  { %s52_s13 = sshll.u32 %s2549_s12, 4  ;;  %s78_s15 = sshll.u32 %s2550_s14, 4  ;;  %s53_s13 = int_to_ptr.vmem [resolvable:$true] %s52_s13  ;;  %s2692_s15 = int_to_ptr.vmem [resolvable:$true] %s78_s15 }
  0x47   :  { %s2445_s4 = scalar_lea.hbm %s2982_s3, 512 }
  0x48   :  { %p2446_p4 = scmp.ne.s32.totalorder %s2982_s3, %s2445_s4  ;;  %p2449_p5 = scmp.lt.u32.totalorder %s2445_s4, %s2982_s3 }
  0x4a   :  { %p2451_p6 = pnand %p2449_p5, %p2446_p4 }
  0x4c   :  { %2454 = shalt.err (!%p2451_p6)
}
  0x4d   :  { %s2455_s0 = scalar_lea.vmem %s53_s13, 512  ;;  %p2460_p8 = scmp.lt.s32.totalorder %s53_s13, %s53_s13 }
  0x4e   :  { %p2456_p7 = scmp.ne.s32.totalorder %s53_s13, %s2455_s0  ;;  %p2461_p9 = scmp.lt.s32.totalorder %s2455_s0, %s2455_s0 }
  0x50   :  { %p2462_p10 = por %p2461_p9, %p2460_p8 }
  0x52   :  { %p2463_p11 = pnand %p2462_p10, %p2456_p7 }
  0x54   :  { %2466 = shalt.err (!%p2463_p11)
}
  0x55   :  { %58 = dma.hbm_to_vmem [thread:$0]  %s2982_s3, 512, %s53_s13, [#allocation6], %s2545_s29, %s2545_s29, %s2546_s30  }
  0x56   :  { %s2467_s24 = scalar_lea.hbm %s2985_s6, 512 }
  0x57   :  { %p2468_p12 = scmp.ne.s32.totalorder %s2985_s6, %s2467_s24  ;;  %p2471_p13 = scmp.lt.u32.totalorder %s2467_s24, %s2985_s6 }
  0x59   :  { %p2473_p0 = pnand %p2471_p13, %p2468_p12 }
  0x5b   :  { %2476 = shalt.err (!%p2473_p0)
}
  0x5c   :  { %s2477_s12 = scalar_lea.vmem %s2692_s15, 512  ;;  %p2482_p2 = scmp.lt.s32.totalorder %s2692_s15, %s2692_s15 }
  0x5d   :  { %p2478_p1 = scmp.ne.s32.totalorder %s2692_s15, %s2477_s12  ;;  %p2483_p3 = scmp.lt.s32.totalorder %s2477_s12, %s2477_s12 }
  0x5f   :  { %p2484_p4 = por %p2483_p3, %p2482_p2 }
  0x61   :  { %p2485_p5 = pnand %p2484_p4, %p2478_p1 }
  0x63   :  { %2488 = shalt.err (!%p2485_p5)
}
  0x64   :  { %84 = dma.hbm_to_vmem [thread:$0]  %s2985_s6, 512, %s2692_s15, [#allocation9], %s2545_s29, %s2545_s29, %s2546_s30  }
  0x65   :  { %s2551_s14 = smov [#allocation13]   ;;  %s2489_s20 = scalar_lea.hbm %s2987_s8, 16 }
  0x66   :  { %s103_s16 = sshll.u32 %s2551_s14, 4  ;;  %p2490_p6 = scmp.ne.s32.totalorder %s2987_s8, %s2489_s20  ;;  %s104_s16 = int_to_ptr.vmem [resolvable:$true] %s103_s16 }
  0x67   :  { %p2493_p7 = scmp.lt.u32.totalorder %s2489_s20, %s2987_s8 }
  0x69   :  { %p2495_p8 = pnand %p2493_p7, %p2490_p6 }
  0x6b   :  { %2498 = shalt.err (!%p2495_p8)
}
  0x6c   :  { %s2499_s27 = scalar_lea.vmem %s104_s16, 16  ;;  %s2503_s6 = scalar_lea.vmem %s104_s16, 32 }
  0x6d   :  { %p2500_p9 = scmp.ne.s32.totalorder %s104_s16, %s2499_s27  ;;  %p2504_p10 = scmp.lt.s32.totalorder %s104_s16, %s104_s16 }
  0x6e   :  { %p2505_p11 = scmp.lt.s32.totalorder %s2503_s6, %s2499_s27 }
  0x70   :  { %p2506_p12 = por %p2505_p11, %p2504_p10 }
  0x72   :  { %p2507_p13 = pnand %p2506_p12, %p2500_p9 }
  0x74   :  { %2510 = shalt.err (!%p2507_p13)
}
  0x75   :  { %106 = dma.hbm_to_vmem [thread:$0]  %s2987_s8, 16, %s104_s16, [#allocation12]  }
  0x76   :  { %2533 = dma.done.wait [#allocation3], 1024  }
  0x77   :  { %2534 = vsyncadd [#allocation3], 4294966272 }
  0x78   :  { %2535 = dma.done.wait [#allocation6], 1024  }
  0x79   :  { %2536 = vsyncadd [#allocation6], 4294966272 }
  0x7a   :  { %2537 = dma.done.wait [#allocation9], 1024  }
  0x7b   :  { %2538 = vsyncadd [#allocation9], 4294966272 }
  0x7c   :  { %2539 = dma.done.wait [#allocation12], 528  }
  0x7d   :  { %2540 = vsyncadd [#allocation12], 4294966768  ;;  %v2552_v0 = vmov 0.0|0.0   ;;  %vm2553_vm0 = vmmov 0   ;;  %v2554_v1 = vmov 0.0   ;;  %vm151_vm1 = vcmask 261120  }
  0x7e   :  { %2157 = vmatprep.subr.bf16.mxu0 %v2552_v0  ;;  %1990 = vmatprep.mubr.msk.f32.mxu0 %vm2553_vm0, %v2554_v1  ;;  %v140_v2 = vld [vmem:[#allocation5] sm:$0xff]  ;;  %v141_v3 = vld [vmem:[#allocation5 + $0x8] sm:$0xff]  ;;  %v142_v4 = vld [vmem:[#allocation5 + $0x10] sm:$0xff]  ;;  %s2556_s18 = smov 32  }
  0x7f   :  { %v2137_v5 = vpack.c.bf16 %v141_v3, %v140_v2  ;;  %v143_v6 = vld [vmem:[#allocation5 + $0x18] sm:$0xff]  ;;  %v132_v7 = vld [vmem:[#allocation2] sm:$0xff]  ;;  %v282_v10 = vld [vmem:[#allocation8 + $0x8] sm:$0xff] }
  0x80   :  { %v2141_v8 = vpack.c.bf16 %v143_v6, %v142_v4  ;;  %1948 = vmatprep.mubr.msk.f32.mxu1 %vm151_vm1, %v132_v7  ;;  %v281_v9 = vld [vmem:[#allocation8] sm:$0xff]  ;;  %v363_v12 = vld [vmem:[#allocation7 + $0x8] sm:$0xff]  ;;  %v364_v16 = vld [vmem:[#allocation7 + $0x10] sm:$0xff] }
  0x81   :  { %2138 = vmatprep.subr.bf16.mxu1 %v2137_v5  ;;  %v362_v11 = vld [vmem:[#allocation7] sm:$0xff]  ;;  %v133_v14 = vld [vmem:[#allocation2 + $0x8] sm:$0xff]  ;;  %v2146_v15 = vpack.c.bf16 %v282_v10, %v281_v9  ;;  %v365_v17 = vld [vmem:[#allocation7 + $0x18] sm:$0xff] }
  0x82   :  { %2140 = vmatpush3.bf16.msra.mxu1 %v2137_v5  ;;  %v2745_v13 = vpack.c.bf16 %v363_v12, %v362_v11  ;;  %v134_v18 = vld [vmem:[#allocation2 + $0x10] sm:$0xff]  ;;  %v284_v20 = vld [vmem:[#allocation8 + $0x18] sm:$0xff]  ;;  %v2751_v21 = vpack.c.bf16 %v365_v17, %v364_v16  ;;  %v136_v24 = vld [vmem:[#allocation2 + $0x20] sm:$0xff] }
  0x83   :  { %2142 = vmatprep.subr.bf16.mxu1 %v2141_v8  ;;  %v283_v19 = vld [vmem:[#allocation8 + $0x10] sm:$0xff]  ;;  %v135_v22 = vld [vmem:[#allocation2 + $0x18] sm:$0xff]  ;;  %v137_v25 = vld [vmem:[#allocation2 + $0x28] sm:$0xff] }
  0x84   :  { %2159 = vmatpush3.bf16.msra.mxu0 %v2745_v13  ;;  %v2149_v23 = vpack.c.bf16 %v284_v20, %v283_v19  ;;  %v138_v26 = vld [vmem:[#allocation2 + $0x30] sm:$0xff]  ;;  %v139_v27 = vld [vmem:[#allocation2 + $0x38] sm:$0xff]  ;;  %v1806_v28 = vld [vmem:[%s2981_s2] ss:$0 sm:$0xff]  ;;  %s2555_s2 = smov 64  }
  0x85   :  { %2160 = vmatprep.subr.bf16.mxu0 %v2552_v0 }
  0x86   :  { %2144 = vmatpush3.bf16.msra.mxu1 %v2141_v8 }
  0x87   :  { %2145 = vmatprep.subr.bf16.mxu1 %v2552_v0 }
  0x88   :  { %2162 = vmatpush3.bf16.msra.mxu0 %v2751_v21 }
  0x89   :  { %1949 = vmatmul.mubr.msk.f32.vlgmr.msra.gmra.mrb[0].mxu1 %vm151_vm1, %v133_v14  ;;  %2169 = vmatprep.subr.bf16.mxu0 %v2552_v0 }
  0x8a   :  { %2147 = vmatpush3.bf16.msra.mxu1 %v2146_v15  ;;  %1951 = vmatprep.mubr.msk.f32.mxu1 %vm151_vm1, %v134_v18 }
  0x8b   :  { %2148 = vmatprep.subr.bf16.mxu1 %v2552_v0 }
  0x8d   :  { %1952 = vmatmul.mubr.msk.f32.gmra.mrb[2].mxu1 %vm151_vm1, %v135_v22 }
  0x8e   :  { %1954 = vmatprep.mubr.msk.f32.mxu1 %vm151_vm1, %v136_v24  ;;  %2150 = vmatpush3.bf16.msra.mxu1 %v2149_v23 }
  0x8f   :  { %2151 = vmatprep.subr.bf16.mxu1 %v2552_v0 }
  0x91   :  { %1955 = vmatmul.mubr.msk.f32.gmra.mrb[4].mxu1 %vm151_vm1, %v137_v25 }
  0x92   :  { %1957 = vmatprep.mubr.msk.f32.mxu1 %vm151_vm1, %v138_v26 }
  0x95   :  { %1958 = vmatmul.mubr.msk.f32.gmra.mrb[6].mxu1 %vm151_vm1, %v139_v27 }
  0x96   :  { %1968 = vmatprep.mubr.msk.f32.mxu1 %vm2553_vm0, %v2554_v1 }
  0x99   :  { %1969 = vmatmul.mubr.msk.f32.vlgmr.msra.gmra.mrb[8].mxu1 %vm151_vm1, %v139_v27 }
  0x9a   :  { %2153 = vmatpush3.bf16.msra.mxu1 %v2745_v13  ;;  %1979 = vmatprep.mubr.msk.f32.mxu1 %vm2553_vm0, %v2554_v1 }
  0x9b   :  { %2154 = vmatprep.subr.bf16.mxu1 %v2552_v0 }
  0x9e   :  { %2156 = vmatpush3.bf16.msra.mxu1 %v2751_v21 }
  0x9f   :  { %2163 = vmatprep.subr.bf16.mxu1 %v2552_v0 }
  0xa1   :  { %1980 = vmatmul.mubr.f32.vlgmr.msra.gmra.mrb[10].mxu1 %v2554_v1 }
  0xa2   :  { %2165 = vmatpush3.bf16.msra.mxu1 %v2745_v13  ;;  %2001 = vmatprep.mubr.msk.f32.mxu1 %vm2553_vm0, %v2554_v1 }
  0xa3   :  { %2166 = vmatprep.subr.bf16.mxu1 %v2552_v0 }
  0xa6   :  { %2168 = vmatpush3.bf16.msra.mxu1 %v2751_v21 }
  0xa7   :  { %2175 = vmatprep.subr.bf16.mxu1 %v2552_v0 }
 0x15c   :  { %v1950_v29 = vpop.f32.mrb[0].mxu1 }
 0x15d   :  { %v248_v30 = vadd.f32 %v1950_v29, %v1806_v28  ;;  %v242_v31 = vpop.f32.mrb[1].mxu1 }
 0x15e   :  { %v243_v44 = vadd.f32 %v1806_v28, %v242_v31 }
 0x160   :  { %v1953_v32 = vpop.f32.mrb[2].mxu1 }
 0x161   :  { %v2782_v33 = vadd.f32 %v1953_v32, %v1806_v28  ;;  %v252_v34 = vpop.f32.mrb[3].mxu1 }
 0x162   :  { %v2784_v35 = vadd.f32 %v1806_v28, %v252_v34 }
 0x164   :  { %v1956_v36 = vpop.f32.mrb[4].mxu1 }
 0x165   :  { %v2786_v37 = vadd.f32 %v1956_v36, %v1806_v28  ;;  %v262_v38 = vpop.f32.mrb[5].mxu1 }
 0x166   :  { %v2788_v39 = vadd.f32 %v1806_v28, %v262_v38 }
 0x168   :  { %v1959_v40 = vpop.f32.mrb[6].mxu1 }
 0x169   :  { %v2790_v41 = vadd.f32 %v1959_v40, %v1806_v28  ;;  %v272_v42 = vpop.f32.mrb[7].mxu1 }
 0x16a   :  { %v2792_v43 = vadd.f32 %v1806_v28, %v272_v42 }
 0x174   :  { %v435_v45 = vpop.f32.mrb[10].mxu1 }
 0x175   :  { %v439_v46 = vadd.f32 %v435_v45, %v243_v44  ;;  %v1981_v47 = vpop.f32.mrb[11].mxu1 }
 0x177   :  { %2253 = vtanh.f32 %v439_v46  ;;  %v1817_v49 = vmul.f32 -1.442695, %v439_v46 }
 0x179   :  { %2255 = vpow2.f32 %v1817_v49 }
 0x181   :  { %v2254_v48 = vpop.eup %2253 }
 0x182   :  { %449 = vrot.lane.b32.xlu0 %v2254_v48, %s2555_s2 }
 0x183   :  { %v2256_v50 = vpop.eup %2255 }
 0x184   :  { %v443_v51 = vadd.f32 1.0, %v2256_v50 }
 0x186   :  { %2257 = vrcp.f32 %v443_v51 }
 0x190   :  { %v2258_v52 = vpop.eup %2257 }
 0x191   :  { %v447_v55 = vmul.f32 0.0, %v2258_v52 }
 0x1f4   :  { %v450_v53 = vpop.permute.xlu0 %449 }
 0x1f5   :  { %v452_v54 = vmul.f32 %v2258_v52, %v450_v53 }
 0x1f7   :  { %454 = vrot.lane.b32.xlu0 %v452_v54, %s2556_s18 }
 0x269   :  { %v455_v56 = vpop.permute.xlu0 %454 }
 0x26a   :  { %v457_v57 = vadd.f32 %v455_v56, %v447_v55 }
 0x26c   :  { %2259 = vtanh.f32 %v457_v57 }
 0x276   :  { %v2260_v58 = vpop.eup %2259 }
 0x277   :  { %460 = vrot.lane.b32.xlu1 %v2260_v58, %s2555_s2 }
 0x2e9   :  { %v461_v59 = vpop.permute.xlu1 %460 }
 0x2ea   :  { %v463_v60 = vmul.f32 %v2258_v52, %v461_v59 }
 0x2ec   :  { %465 = vrot.lane.b32.xlu1 %v463_v60, %s2556_s18 }
 0x35e   :  { %v466_v61 = vpop.permute.xlu1 %465 }
 0x35f   :  { %1991 = vmatmul.mubr.msk.f32.vlgmr.msra.gmra.mrb[0].mxu0 %vm151_vm1, %v466_v61 }
 0x360   :  { %2171 = vmatpush3.bf16.msra.mxu0 %v2745_v13  ;;  %2012 = vmatprep.mubr.msk.f32.mxu0 %vm2553_vm0, %v2554_v1 }
 0x361   :  { %2172 = vmatprep.subr.bf16.mxu0 %v2552_v0 }
 0x364   :  { %2174 = vmatpush3.bf16.msra.mxu0 %v2751_v21 }
 0x365   :  { %2181 = vmatprep.subr.bf16.mxu0 %v2552_v0 }
 0x432   :  { %v535_v62 = vpop.f32.mrb[0].mxu0 }
 0x433   :  { %v539_v63 = vadd.f32 %v535_v62, %v248_v30  ;;  %v1992_v2 = vpop.f32.mrb[1].mxu0 }
 0x435   :  { %2261 = vtanh.f32 %v539_v63  ;;  %v1819_v4 = vmul.f32 -1.442695, %v539_v63 }
 0x437   :  { %2263 = vpow2.f32 %v1819_v4 }
 0x43f   :  { %v2262_v3 = vpop.eup %2261 }
 0x440   :  { %549 = vrot.lane.b32.xlu0 %v2262_v3, %s2555_s2 }
 0x441   :  { %v2264_v5 = vpop.eup %2263 }
 0x442   :  { %v543_v6 = vadd.f32 1.0, %v2264_v5 }
 0x444   :  { %2265 = vrcp.f32 %v543_v6 }
 0x44e   :  { %v2266_v7 = vpop.eup %2265 }
 0x44f   :  { %v547_v10 = vmul.f32 %v2266_v7, %v457_v57 }
 0x4b2   :  { %v550_v8 = vpop.permute.xlu0 %549 }
 0x4b3   :  { %v552_v9 = vmul.f32 %v2266_v7, %v550_v8 }
 0x4b5   :  { %554 = vrot.lane.b32.xlu1 %v552_v9, %s2556_s18 }
 0x527   :  { %v555_v11 = vpop.permute.xlu1 %554 }
 0x528   :  { %v557_v12 = vadd.f32 %v555_v11, %v547_v10 }
 0x52a   :  { %2267 = vtanh.f32 %v557_v12 }
 0x534   :  { %v2268_v14 = vpop.eup %2267 }
 0x535   :  { %560 = vrot.lane.b32.xlu0 %v2268_v14, %s2555_s2 }
 0x5a7   :  { %v561_v15 = vpop.permute.xlu0 %560 }
 0x5a8   :  { %v563_v16 = vmul.f32 %v2266_v7, %v561_v15 }
 0x5aa   :  { %565 = vrot.lane.b32.xlu1 %v563_v16, %s2556_s18 }
 0x61c   :  { %v566_v17 = vpop.permute.xlu1 %565 }
 0x61d   :  { %2002 = vmatmul.mubr.msk.f32.vlgmr.msra.gmra.mrb[12].mxu1 %vm151_vm1, %v566_v17 }
 0x61e   :  { %2177 = vmatpush3.bf16.msra.mxu1 %v2745_v13  ;;  %2023 = vmatprep.mubr.msk.f32.mxu1 %vm2553_vm0, %v2554_v1 }
 0x61f   :  { %2178 = vmatprep.subr.bf16.mxu1 %v2552_v0 }
 0x622   :  { %2180 = vmatpush3.bf16.msra.mxu1 %v2751_v21 }
 0x623   :  { %2187 = vmatprep.subr.bf16.mxu1 %v2552_v0 }
 0x6f0   :  { %v635_v18 = vpop.f32.mrb[12].mxu1 }
 0x6f1   :  { %v639_v19 = vadd.f32 %v635_v18, %v2784_v35  ;;  %v2003_v20 = vpop.f32.mrb[13].mxu1 }
 0x6f3   :  { %2269 = vtanh.f32 %v639_v19  ;;  %v1821_v23 = vmul.f32 -1.442695, %v639_v19 }
 0x6f5   :  { %2271 = vpow2.f32 %v1821_v23 }
 0x6fd   :  { %v2270_v22 = vpop.eup %2269 }
 0x6fe   :  { %649 = vrot.lane.b32.xlu0 %v2270_v22, %s2555_s2 }
 0x6ff   :  { %v2272_v24 = vpop.eup %2271 }
 0x700   :  { %v643_v25 = vadd.f32 1.0, %v2272_v24 }
 0x702   :  { %2273 = vrcp.f32 %v643_v25 }
 0x70c   :  { %v2274_v26 = vpop.eup %2273 }
 0x70d   :  { %v647_v29 = vmul.f32 %v2274_v26, %v557_v12 }
 0x770   :  { %v650_v27 = vpop.permute.xlu0 %649 }
 0x771   :  { %v652_v28 = vmul.f32 %v2274_v26, %v650_v27 }
 0x773   :  { %654 = vrot.lane.b32.xlu1 %v652_v28, %s2556_s18 }
 0x7e5   :  { %v655_v30 = vpop.permute.xlu1 %654 }
 0x7e6   :  { %v657_v31 = vadd.f32 %v655_v30, %v647_v29 }
 0x7e8   :  { %2275 = vtanh.f32 %v657_v31 }
 0x7f2   :  { %v2276_v32 = vpop.eup %2275 }
 0x7f3   :  { %660 = vrot.lane.b32.xlu0 %v2276_v32, %s2555_s2 }
 0x865   :  { %v661_v34 = vpop.permute.xlu0 %660 }
 0x866   :  { %v663_v35 = vmul.f32 %v2274_v26, %v661_v34 }
 0x868   :  { %665 = vrot.lane.b32.xlu1 %v663_v35, %s2556_s18 }
 0x8da   :  { %v666_v36 = vpop.permute.xlu1 %665 }
 0x8db   :  { %2013 = vmatmul.mubr.msk.f32.vlgmr.msra.gmra.mrb[2].mxu0 %vm151_vm1, %v666_v36 }
 0x8dc   :  { %2183 = vmatpush3.bf16.msra.mxu0 %v2745_v13  ;;  %2034 = vmatprep.mubr.msk.f32.mxu0 %vm2553_vm0, %v2554_v1 }
 0x8dd   :  { %2184 = vmatprep.subr.bf16.mxu0 %v2552_v0 }
 0x8e0   :  { %2186 = vmatpush3.bf16.msra.mxu0 %v2751_v21 }
 0x8e1   :  { %2193 = vmatprep.subr.bf16.mxu0 %v2552_v0 }
 0x9ae   :  { %v735_v38 = vpop.f32.mrb[2].mxu0 }
 0x9af   :  { %v739_v40 = vadd.f32 %v735_v38, %v2782_v33  ;;  %v2014_v42 = vpop.f32.mrb[3].mxu0 }
 0x9b1   :  { %2277 = vtanh.f32 %v739_v40  ;;  %v1823_v45 = vmul.f32 -1.442695, %v739_v40 }
 0x9b3   :  { %2279 = vpow2.f32 %v1823_v45 }
 0x9bb   :  { %v2278_v44 = vpop.eup %2277 }
 0x9bc   :  { %749 = vrot.lane.b32.xlu0 %v2278_v44, %s2555_s2 }
 0x9bd   :  { %v2280_v46 = vpop.eup %2279 }
 0x9be   :  { %v743_v47 = vadd.f32 1.0, %v2280_v46 }
 0x9c0   :  { %2281 = vrcp.f32 %v743_v47 }
 0x9ca   :  { %v2282_v48 = vpop.eup %2281 }
 0x9cb   :  { %v747_v51 = vmul.f32 %v2282_v48, %v657_v31 }
 0xa2e   :  { %v750_v49 = vpop.permute.xlu0 %749 }
 0xa2f   :  { %v752_v50 = vmul.f32 %v2282_v48, %v750_v49 }
 0xa31   :  { %754 = vrot.lane.b32.xlu1 %v752_v50, %s2556_s18 }
 0xaa3   :  { %v755_v52 = vpop.permute.xlu1 %754 }
 0xaa4   :  { %v757_v53 = vadd.f32 %v755_v52, %v747_v51 }
 0xaa6   :  { %2283 = vtanh.f32 %v757_v53 }
 0xab0   :  { %v2284_v33 = vpop.eup %2283 }
 0xab1   :  { %760 = vrot.lane.b32.xlu0 %v2284_v33, %s2555_s2 }
 0xb23   :  { %v761_v54 = vpop.permute.xlu0 %760 }
 0xb24   :  { %v763_v55 = vmul.f32 %v2282_v48, %v761_v54 }
 0xb26   :  { %765 = vrot.lane.b32.xlu1 %v763_v55, %s2556_s18 }
 0xb98   :  { %v766_v56 = vpop.permute.xlu1 %765 }
 0xb99   :  { %2024 = vmatmul.mubr.msk.f32.vlgmr.msra.gmra.mrb[14].mxu1 %vm151_vm1, %v766_v56 }
 0xb9a   :  { %2189 = vmatpush3.bf16.msra.mxu1 %v2745_v13  ;;  %2045 = vmatprep.mubr.msk.f32.mxu1 %vm2553_vm0, %v2554_v1 }
 0xb9b   :  { %2190 = vmatprep.subr.bf16.mxu1 %v2552_v0 }
 0xb9e   :  { %2192 = vmatpush3.bf16.msra.mxu1 %v2751_v21 }
 0xb9f   :  { %2199 = vmatprep.subr.bf16.mxu1 %v2552_v0 }
 0xc6c   :  { %v835_v57 = vpop.f32.mrb[14].mxu1 }
 0xc6d   :  { %v839_v58 = vadd.f32 %v835_v57, %v2788_v39  ;;  %v2025_v59 = vpop.f32.mrb[15].mxu1 }
 0xc6f   :  { %2285 = vtanh.f32 %v839_v58  ;;  %v1825_v61 = vmul.f32 -1.442695, %v839_v58 }
 0xc71   :  { %2287 = vpow2.f32 %v1825_v61  ;;  %v1166_v61 = vld [vmem:[#allocation10 + $0x10] sm:$0xff] }
 0xc79   :  { %v2286_v60 = vpop.eup %2285 }
 0xc7a   :  { %849 = vrot.lane.b32.xlu0 %v2286_v60, %s2555_s2  ;;  %v1165_v60 = vld [vmem:[#allocation10 + $0x8] sm:$0xff] }
 0xc7b   :  { %v2288_v62 = vpop.eup %2287 }
 0xc7c   :  { %v843_v63 = vadd.f32 1.0, %v2288_v62 }
 0xc7e   :  { %2289 = vrcp.f32 %v843_v63  ;;  %v1167_v63 = vld [vmem:[#allocation10 + $0x18] sm:$0xff] }
 0xc88   :  { %v2290_v2 = vpop.eup %2289 }
 0xc89   :  { %v847_v5 = vmul.f32 %v2290_v2, %v757_v53 }
 0xcec   :  { %v850_v3 = vpop.permute.xlu0 %849 }
 0xced   :  { %v852_v4 = vmul.f32 %v2290_v2, %v850_v3 }
 0xcef   :  { %854 = vrot.lane.b32.xlu1 %v852_v4, %s2556_s18 }
 0xd61   :  { %v855_v6 = vpop.permute.xlu1 %854 }
 0xd62   :  { %v857_v7 = vadd.f32 %v855_v6, %v847_v5 }
 0xd64   :  { %2291 = vtanh.f32 %v857_v7 }
 0xd6e   :  { %v2292_v39 = vpop.eup %2291 }
 0xd6f   :  { %860 = vrot.lane.b32.xlu0 %v2292_v39, %s2555_s2 }
 0xde1   :  { %v861_v8 = vpop.permute.xlu0 %860 }
 0xde2   :  { %v863_v9 = vmul.f32 %v2290_v2, %v861_v8  ;;  %v2203_v2 = vpack.c.bf16 %v1167_v63, %v1166_v61 }
 0xde4   :  { %865 = vrot.lane.b32.xlu1 %v863_v9, %s2556_s18 }
 0xe56   :  { %v866_v10 = vpop.permute.xlu1 %865 }
 0xe57   :  { %2035 = vmatmul.mubr.msk.f32.vlgmr.msra.gmra.mrb[4].mxu0 %vm151_vm1, %v866_v10 }
 0xe58   :  { %2195 = vmatpush3.bf16.msra.mxu0 %v2745_v13  ;;  %2056 = vmatprep.mubr.msk.f32.mxu0 %vm2553_vm0, %v2554_v1 }
 0xe59   :  { %2196 = vmatprep.subr.bf16.mxu0 %v2552_v0 }
 0xe5c   :  { %2198 = vmatpush3.bf16.msra.mxu0 %v2751_v21 }
 0xe5d   :  { %2205 = vmatprep.subr.bf16.mxu0 %v2552_v0 }
 0xf2a   :  { %v935_v11 = vpop.f32.mrb[4].mxu0 }
 0xf2b   :  { %v939_v12 = vadd.f32 %v935_v11, %v2786_v37  ;;  %v2036_v14 = vpop.f32.mrb[5].mxu0 }
 0xf2d   :  { %2293 = vtanh.f32 %v939_v12  ;;  %v1827_v16 = vmul.f32 -1.442695, %v939_v12 }
 0xf2f   :  { %2295 = vpow2.f32 %v1827_v16 }
 0xf37   :  { %v2294_v15 = vpop.eup %2293 }
 0xf38   :  { %949 = vrot.lane.b32.xlu0 %v2294_v15, %s2555_s2 }
 0xf39   :  { %v2296_v13 = vpop.eup %2295 }
 0xf3a   :  { %v943_v17 = vadd.f32 1.0, %v2296_v13 }
 0xf3c   :  { %2297 = vrcp.f32 %v943_v17 }
 0xf46   :  { %v2298_v18 = vpop.eup %2297 }
 0xf47   :  { %v947_v21 = vmul.f32 %v2298_v18, %v857_v7  ;;  %v1815_v7 = vld [vmem:[%s2984_s5] ss:$0 sm:$0xff] }
 0xfaa   :  { %v950_v19 = vpop.permute.xlu0 %949 }
 0xfab   :  { %v952_v20 = vmul.f32 %v2298_v18, %v950_v19 }
 0xfad   :  { %954 = vrot.lane.b32.xlu1 %v952_v20, %s2556_s18  ;;  %v1268_v20 = vld [vmem:[#allocation11] sm:$0xff] }
0x101f   :  { %v955_v22 = vpop.permute.xlu1 %954 }
0x1020   :  { %v957_v23 = vadd.f32 %v955_v22, %v947_v21  ;;  %v1269_v21 = vld [vmem:[#allocation11 + $0x8] sm:$0xff]  ;;  %v1270_v22 = vld [vmem:[#allocation11 + $0x10] sm:$0xff] }
0x1022   :  { %2299 = vtanh.f32 %v957_v23 }
0x102c   :  { %v2300_v37 = vpop.eup %2299 }
0x102d   :  { %960 = vrot.lane.b32.xlu0 %v2300_v37, %s2555_s2  ;;  %v1271_v37 = vld [vmem:[#allocation11 + $0x18] sm:$0xff] }
0x109f   :  { %v961_v24 = vpop.permute.xlu0 %960 }
0x10a0   :  { %v963_v25 = vmul.f32 %v2298_v18, %v961_v24  ;;  %v2209_v24 = vpack.c.bf16 %v1271_v37, %v1270_v22 }
0x10a2   :  { %965 = vrot.lane.b32.xlu1 %v963_v25, %s2556_s18 }
0x1114   :  { %v966_v26 = vpop.permute.xlu1 %965 }
0x1115   :  { %2046 = vmatmul.mubr.msk.f32.vlgmr.msra.gmra.mrb[16].mxu1 %vm151_vm1, %v966_v26 }
0x1116   :  { %2067 = vmatprep.mubr.msk.f32.mxu1 %vm2553_vm0, %v2554_v1 }
0x11e8   :  { %v1035_v27 = vpop.f32.mrb[16].mxu1 }
0x11e9   :  { %v1039_v28 = vadd.f32 %v1035_v27, %v2792_v43  ;;  %v2047_v29 = vpop.f32.mrb[17].mxu1 }
0x11ea   :  { %v2897_v29 = vld [vmem:[#allocation13] ss:$0 sm:$0xff] }
0x11eb   :  { %2301 = vtanh.f32 %v1039_v28  ;;  %v1829_v31 = vmul.f32 -1.442695, %v1039_v28 }
0x11ed   :  { %2303 = vpow2.f32 %v1829_v31 }
0x11f5   :  { %v2302_v30 = vpop.eup %2301 }
0x11f6   :  { %1049 = vrot.lane.b32.xlu0 %v2302_v30, %s2555_s2 }
0x11f7   :  { %v2304_v32 = vpop.eup %2303 }
0x11f8   :  { %v1043_v34 = vadd.f32 1.0, %v2304_v32 }
0x11fa   :  { %2305 = vrcp.f32 %v1043_v34 }
0x1204   :  { %v2306_v35 = vpop.eup %2305 }
0x1205   :  { %v1047_v40 = vmul.f32 %v2306_v35, %v957_v23  ;;  %v2206_v23 = vpack.c.bf16 %v1269_v21, %v1268_v20 }
0x1268   :  { %v1050_v36 = vpop.permute.xlu0 %1049 }
0x1269   :  { %v1052_v38 = vmul.f32 %v2306_v35, %v1050_v36 }
0x126b   :  { %1054 = vrot.lane.b32.xlu1 %v1052_v38, %s2556_s18 }
0x12dd   :  { %v1055_v42 = vpop.permute.xlu1 %1054 }
0x12de   :  { %v1057_v44 = vadd.f32 %v1055_v42, %v1047_v40 }
0x12e0   :  { %2307 = vtanh.f32 %v1057_v44 }
0x12ea   :  { %v2308_v43 = vpop.eup %2307 }
0x12eb   :  { %1060 = vrot.lane.b32.xlu0 %v2308_v43, %s2555_s2 }
0x135d   :  { %v1061_v45 = vpop.permute.xlu0 %1060 }
0x135e   :  { %v1063_v46 = vmul.f32 %v2306_v35, %v1061_v45 }
0x1360   :  { %1065 = vrot.lane.b32.xlu1 %v1063_v46, %s2556_s18 }
0x13d2   :  { %v1066_v47 = vpop.permute.xlu1 %1065 }
0x13d3   :  { %2057 = vmatmul.mubr.msk.f32.vlgmr.msra.gmra.mrb[6].mxu0 %vm151_vm1, %v1066_v47 }
0x13d4   :  { %2078 = vmatprep.mubr.msk.f32.mxu0 %vm2553_vm0, %v2554_v1  ;;  %2207 = vmatpush3.bf16.msra.mxu0 %v2206_v23 }
0x13d5   :  { %2208 = vmatprep.subr.bf16.mxu0 %v2552_v0 }
0x13d8   :  { %2210 = vmatpush3.bf16.msra.mxu0 %v2209_v24 }
0x13d9   :  { %2217 = vmatprep.subr.bf16.mxu0 %v2552_v0 }
0x14a6   :  { %v1135_v48 = vpop.f32.mrb[6].mxu0 }
0x14a7   :  { %v1139_v49 = vadd.f32 %v1135_v48, %v2790_v41  ;;  %v2058_v50 = vpop.f32.mrb[7].mxu0  ;;  %v1164_v41 = vld [vmem:[#allocation10] sm:$0xff] }
0x14a8   :  { %v2200_v62 = vpack.c.bf16 %v1165_v60, %v1164_v41 }
0x14a9   :  { %2309 = vtanh.f32 %v1139_v49  ;;  %v1831_v52 = vmul.f32 -1.442695, %v1139_v49 }
0x14aa   :  { %2201 = vmatpush3.bf16.msra.mxu1 %v2200_v62 }
0x14ab   :  { %2311 = vpow2.f32 %v1831_v52  ;;  %2202 = vmatprep.subr.bf16.mxu1 %v2552_v0 }
0x14ae   :  { %2204 = vmatpush3.bf16.msra.mxu1 %v2203_v2 }
0x14af   :  { %2211 = vmatprep.subr.bf16.mxu1 %v2552_v0 }
0x14b3   :  { %v2310_v51 = vpop.eup %2309 }
0x14b4   :  { %1149 = vrot.lane.b32.xlu0 %v2310_v51, %s2555_s2 }
0x14b5   :  { %v2312_v53 = vpop.eup %2311 }
0x14b6   :  { %v1143_v33 = vadd.f32 1.0, %v2312_v53 }
0x14b8   :  { %2313 = vrcp.f32 %v1143_v33 }
0x14c2   :  { %v2314_v54 = vpop.eup %2313 }
0x14c3   :  { %v1147_v57 = vmul.f32 %v2314_v54, %v1057_v44 }
0x1526   :  { %v1150_v55 = vpop.permute.xlu0 %1149 }
0x1527   :  { %v1152_v56 = vmul.f32 %v2314_v54, %v1150_v55 }
0x1529   :  { %1154 = vrot.lane.b32.xlu1 %v1152_v56, %s2556_s18 }
0x159b   :  { %v1155_v58 = vpop.permute.xlu1 %1154 }
0x159c   :  { %v1157_v59 = vadd.f32 %v1155_v58, %v1147_v57 }
0x159e   :  { %2315 = vtanh.f32 %v1157_v59 }
0x15a8   :  { %v2316_v3 = vpop.eup %2315 }
0x15a9   :  { %1160 = vrot.lane.b32.xlu0 %v2316_v3, %s2555_s2  ;;  %v1675_v3 = vld [vmem:[%s2988_s9] sm:$0xff] }
0x161b   :  { %v1161_v4 = vpop.permute.xlu0 %1160 }
0x161c   :  { %v1163_v5 = vmul.f32 %v2314_v54, %v1161_v4  ;;  %v1676_v4 = vld [vmem:[%s2988_s9 + $0x8] sm:$0xff] }
0x161e   :  { %1169 = vrot.lane.b32.xlu1 %v1163_v5, %s2556_s18  ;;  %v2230_v5 = vpack.c.bf16 %v1676_v4, %v1675_v3 }
0x1690   :  { %v1170_v6 = vpop.permute.xlu1 %1169 }
0x1691   :  { %2068 = vmatmul.mubr.msk.f32.vlgmr.msra.gmra.mrb[8].mxu1 %vm151_vm1, %v1170_v6  ;;  %v1677_v6 = vld [vmem:[%s2988_s9 + $0x10] sm:$0xff] }
0x1692   :  { %2089 = vmatprep.mubr.msk.f32.mxu1 %vm2553_vm0, %v2554_v1  ;;  %2213 = vmatpush3.bf16.msra.mxu1 %v2206_v23 }
0x1693   :  { %2214 = vmatprep.subr.bf16.mxu1 %v2552_v0 }
0x1696   :  { %2216 = vmatpush3.bf16.msra.mxu1 %v2209_v24 }
0x1697   :  { %2223 = vmatprep.subr.bf16.mxu1 %v2552_v0 }
0x1764   :  { %v1239_v39 = vpop.f32.mrb[8].mxu1 }
0x1765   :  { %v2235_v8 = vadd.f32 %v1815_v7, %v1239_v39  ;;  %v2069_v9 = vpop.f32.mrb[9].mxu1  ;;  %v1678_v7 = vld [vmem:[%s2988_s9 + $0x18] sm:$0xff] }
0x1767   :  { %2317 = vtanh.f32 %v2235_v8  ;;  %v1833_v11 = vmul.f32 -1.442695, %v2235_v8  ;;  %v2233_v8 = vpack.c.bf16 %v1678_v7, %v1677_v6 }
0x1769   :  { %2319 = vpow2.f32 %v1833_v11  ;;  %v2943_v11 = vld [vmem:[%s2989_s10] ss:$0 sm:$0xff]  ;;  %s2557_s10 = smov [#allocation14]  }
0x176a   :  { %s1791_s17 = sshll.u32 %s2557_s10, 4  ;;  %s1792_s17 = int_to_ptr.vmem [resolvable:$true] %s1791_s17 }
0x176b   :  { %s2511_s4 = scalar_lea.vmem %s1792_s17, 640  ;;  %p2516_p1 = scmp.lt.s32.totalorder %s1792_s17, %s1792_s17 }
0x176c   :  { %p2512_p0 = scmp.ne.s32.totalorder %s1792_s17, %s2511_s4  ;;  %p2517_p2 = scmp.lt.s32.totalorder %s2511_s4, %s2511_s4 }
0x176e   :  { %p2518_p3 = por %p2517_p2, %p2516_p1 }
0x1770   :  { %p2519_p4 = pnand %p2518_p3, %p2512_p0 }
0x1771   :  { %v2318_v10 = vpop.eup %2317 }
0x1772   :  { %1253 = vrot.lane.b32.xlu0 %v2318_v10, %s2555_s2 }
0x1773   :  { %v2320_v12 = vpop.eup %2319 }
0x1774   :  { %v1247_v14 = vadd.f32 1.0, %v2320_v12 }
0x1776   :  { %2321 = vrcp.f32 %v1247_v14 }
0x1780   :  { %v2322_v15 = vpop.eup %2321 }
0x1781   :  { %v1251_v17 = vmul.f32 %v2322_v15, %v1157_v59 }
0x17e4   :  { %v1254_v16 = vpop.permute.xlu0 %1253 }
0x17e5   :  { %v1256_v13 = vmul.f32 %v2322_v15, %v1254_v16 }
0x17e7   :  { %1258 = vrot.lane.b32.xlu1 %v1256_v13, %s2556_s18 }
0x1859   :  { %v1259_v18 = vpop.permute.xlu1 %1258 }
0x185a   :  { %v1261_v19 = vadd.f32 %v1259_v18, %v1251_v17 }
0x185c   :  { %2323 = vtanh.f32 %v1261_v19 }
0x1866   :  { %v2324_v25 = vpop.eup %2323 }
0x1867   :  { %1264 = vrot.lane.b32.xlu0 %v2324_v25, %s2555_s2 }
0x18d9   :  { %v1265_v26 = vpop.permute.xlu0 %1264 }
0x18da   :  { %v1267_v27 = vmul.f32 %v2322_v15, %v1265_v26 }
0x18dc   :  { %1280 = vrot.lane.b32.xlu1 %v1267_v27, %s2556_s18 }
0x194e   :  { %v2889_v28 = vpop.permute.xlu1 %1280 }
0x194f   :  { %2079 = vmatmul.mubr.msk.f32.vlgmr.msra.gmra.mrb[8].mxu0 %vm151_vm1, %v2889_v28 }
0x1950   :  { %2219 = vmatpush3.bf16.msra.mxu0 %v2206_v23  ;;  %2100 = vmatprep.mubr.msk.f32.mxu0 %vm2553_vm0, %v2554_v1 }
0x1951   :  { %2220 = vmatprep.subr.bf16.mxu0 %v2552_v0 }
0x1954   :  { %2222 = vmatpush3.bf16.msra.mxu0 %v2209_v24 }
0x1955   :  { %2229 = vmatprep.subr.bf16.mxu0 %v2552_v0 }
0x1a22   :  { %v1350_v30 = vpop.f32.mrb[8].mxu0 }
0x1a23   :  { %v1351_v31 = vadd.f32 %v2897_v29, %v1350_v30  ;;  %v2080_v32 = vpop.f32.mrb[9].mxu0 }
0x1a25   :  { %2325 = vtanh.f32 %v1351_v31  ;;  %v1836_v35 = vmul.f32 -1.442695, %v1351_v31 }
0x1a27   :  { %2327 = vpow2.f32 %v1836_v35 }
0x1a2f   :  { %v2326_v34 = vpop.eup %2325 }
0x1a30   :  { %1363 = vrot.lane.b32.xlu0 %v2326_v34, %s2555_s2 }
0x1a31   :  { %v2328_v36 = vpop.eup %2327 }
0x1a32   :  { %v1357_v38 = vadd.f32 1.0, %v2328_v36 }
0x1a34   :  { %2329 = vrcp.f32 %v1357_v38 }
0x1a3e   :  { %v2330_v40 = vpop.eup %2329 }
0x1a3f   :  { %v1361_v43 = vmul.f32 %v2330_v40, %v1261_v19 }
0x1aa2   :  { %v1364_v42 = vpop.permute.xlu0 %1363 }
0x1aa3   :  { %v1366_v44 = vmul.f32 %v2330_v40, %v1364_v42 }
0x1aa5   :  { %1368 = vrot.lane.b32.xlu1 %v1366_v44, %s2556_s18 }
0x1b17   :  { %v1369_v45 = vpop.permute.xlu1 %1368 }
0x1b18   :  { %v1371_v46 = vadd.f32 %v1369_v45, %v1361_v43 }
0x1b1a   :  { %2331 = vtanh.f32 %v1371_v46 }
0x1b24   :  { %v2332_v47 = vpop.eup %2331 }
0x1b25   :  { %1374 = vrot.lane.b32.xlu0 %v2332_v47, %s2555_s2 }
0x1b97   :  { %v1375_v48 = vpop.permute.xlu0 %1374 }
0x1b98   :  { %v1377_v49 = vmul.f32 %v2330_v40, %v1375_v48 }
0x1b9a   :  { %1379 = vrot.lane.b32.xlu1 %v1377_v49, %s2556_s18 }
0x1c0c   :  { %v1380_v50 = vpop.permute.xlu1 %1379 }
0x1c0d   :  { %2090 = vmatmul.mubr.msk.f32.vlgmr.msra.gmra.mrb[18].mxu1 %vm151_vm1, %v1380_v50 }
0x1c0e   :  { %2225 = vmatpush3.bf16.msra.mxu1 %v2206_v23  ;;  %2111 = vmatprep.mubr.msk.f32.mxu1 %vm2553_vm0, %v2554_v1 }
0x1c0f   :  { %2226 = vmatprep.subr.bf16.mxu1 %v2552_v0 }
0x1c12   :  { %2228 = vmatpush3.bf16.msra.mxu1 %v2209_v24 }
0x1ce0   :  { %v1449_v51 = vpop.f32.mrb[18].mxu1 }
0x1ce1   :  { %v1450_v52 = vadd.f32 %v2897_v29, %v1449_v51  ;;  %v2091_v53 = vpop.f32.mrb[19].mxu1 }
0x1ce3   :  { %2333 = vtanh.f32 %v1450_v52  ;;  %v1838_v54 = vmul.f32 -1.442695, %v1450_v52 }
0x1ce5   :  { %2335 = vpow2.f32 %v1838_v54 }
0x1ced   :  { %v2334_v33 = vpop.eup %2333 }
0x1cee   :  { %1462 = vrot.lane.b32.xlu0 %v2334_v33, %s2555_s2 }
0x1cef   :  { %v2336_v55 = vpop.eup %2335 }
0x1cf0   :  { %v1456_v56 = vadd.f32 1.0, %v2336_v55 }
0x1cf2   :  { %2337 = vrcp.f32 %v1456_v56 }
0x1cfc   :  { %v2338_v57 = vpop.eup %2337 }
0x1cfd   :  { %v1460_v41 = vmul.f32 %v2338_v57, %v1371_v46 }
0x1d60   :  { %v1463_v58 = vpop.permute.xlu0 %1462 }
0x1d61   :  { %v1465_v59 = vmul.f32 %v2338_v57, %v1463_v58 }
0x1d63   :  { %1467 = vrot.lane.b32.xlu1 %v1465_v59, %s2556_s18 }
0x1dd5   :  { %v1468_v60 = vpop.permute.xlu1 %1467 }
0x1dd6   :  { %v1470_v61 = vadd.f32 %v1468_v60, %v1460_v41 }
0x1dd8   :  { %2339 = vtanh.f32 %v1470_v61 }
0x1de2   :  { %v2340_v62 = vpop.eup %2339 }
0x1de3   :  { %1473 = vrot.lane.b32.xlu0 %v2340_v62, %s2555_s2 }
0x1e55   :  { %v1474_v63 = vpop.permute.xlu0 %1473 }
0x1e56   :  { %v1476_v2 = vmul.f32 %v2338_v57, %v1474_v63 }
0x1e58   :  { %1478 = vrot.lane.b32.xlu1 %v1476_v2, %s2556_s18 }
0x1eca   :  { %v1479_v39 = vpop.permute.xlu1 %1478 }
0x1ecb   :  { %2101 = vmatmul.mubr.msk.f32.vlgmr.msra.gmra.mrb[10].mxu0 %vm151_vm1, %v1479_v39 }
0x1ecc   :  { %2231 = vmatpush3.bf16.msra.mxu0 %v2230_v5  ;;  %2122 = vmatprep.mubr.msk.f32.mxu0 %vm2553_vm0, %v2554_v1 }
0x1ecd   :  { %2232 = vmatprep.subr.bf16.mxu0 %v2552_v0 }
0x1ed0   :  { %2234 = vmatpush3.bf16.msra.mxu0 %v2233_v8 }
0x1ed3   :  { %2123 = vmatmul.mubr.msk.f32.vlgmr.msra.gmra.mrb[12].mxu0 %vm151_vm1, %v2889_v28 }
0x1ed4   :  { %2125 = vmatprep.mubr.msk.f32.mxu0 %vm2553_vm0, %v2554_v1 }
0x1ed7   :  { %2126 = vmatmul.mubr.msk.f32.gmra.mrb[14].mxu0 %vm151_vm1, %v1380_v50 }
0x1ed8   :  { %2128 = vmatprep.mubr.msk.f32.mxu0 %vm2553_vm0, %v2554_v1 }
0x1edb   :  { %2129 = vmatmul.mubr.msk.f32.gmra.mrb[16].mxu0 %vm151_vm1, %v1479_v39 }
0x1edc   :  { %2131 = vmatprep.mubr.msk.f32.mxu0 %vm2553_vm0, %v2554_v1 }
0x1f9e   :  { %v1548_v9 = vpop.f32.mrb[10].mxu0 }
0x1f9f   :  { %v1549_v0 = vadd.f32 %v2897_v29, %v1548_v9  ;;  %v2102_v10 = vpop.f32.mrb[11].mxu0 }
0x1fa1   :  { %2341 = vtanh.f32 %v1549_v0  ;;  %v1840_v22 = vmul.f32 -1.442695, %v1549_v0 }
0x1fa3   :  { %2343 = vpow2.f32 %v1840_v22 }
0x1fa6   :  { %v1757_v12 = vpop.f32.mrb[12].mxu0 }
0x1fa7   :  { %v1758_v14 = vadd.f32 %v2943_v11, %v1757_v12  ;;  %v2124_v15 = vpop.f32.mrb[13].mxu0 }
0x1fa9   :  { %1781 = vst [vmem:[#allocation14] sm:$0xff] %v1758_v14 }
0x1faa   :  { %v1762_v16 = vpop.f32.mrb[14].mxu0 }
0x1fab   :  { %v2342_v13 = vpop.eup %2341  ;;  %v1763_v17 = vadd.f32 %v2943_v11, %v1762_v16  ;;  %v2127_v18 = vpop.f32.mrb[15].mxu0 }
0x1fac   :  { %1561 = vrot.lane.b32.xlu0 %v2342_v13, %s2555_s2 }
0x1fad   :  { %1782 = vst [vmem:[#allocation14 + $0x8] sm:$0xff] %v1763_v17  ;;  %v2344_v23 = vpop.eup %2343 }
0x1fae   :  { %v1767_v19 = vpop.f32.mrb[16].mxu0  ;;  %v1555_v37 = vadd.f32 1.0, %v2344_v23 }
0x1faf   :  { %v1768_v20 = vadd.f32 %v2943_v11, %v1767_v19  ;;  %v2130_v21 = vpop.f32.mrb[17].mxu0 }
0x1fb0   :  { %2345 = vrcp.f32 %v1555_v37 }
0x1fb1   :  { %1783 = vst [vmem:[#allocation14 + $0x10] sm:$0xff] %v1768_v20 }
0x1fba   :  { %v2346_v24 = vpop.eup %2345 }
0x1fbb   :  { %v1559_v27 = vmul.f32 %v2346_v24, %v1470_v61 }
0x201e   :  { %v1562_v25 = vpop.permute.xlu0 %1561 }
0x201f   :  { %v1564_v26 = vmul.f32 %v2346_v24, %v1562_v25 }
0x2021   :  { %1566 = vrot.lane.b32.xlu1 %v1564_v26, %s2556_s18 }
0x2093   :  { %v1567_v28 = vpop.permute.xlu1 %1566 }
0x2094   :  { %v1569_v30 = vadd.f32 %v1567_v28, %v1559_v27 }
0x2096   :  { %2347 = vtanh.f32 %v1569_v30 }
0x20a0   :  { %v2348_v31 = vpop.eup %2347 }
0x20a1   :  { %1572 = vrot.lane.b32.xlu0 %v2348_v31, %s2555_s2 }
0x2113   :  { %v1573_v32 = vpop.permute.xlu0 %1572 }
0x2114   :  { %v1575_v34 = vmul.f32 %v2346_v24, %v1573_v32 }
0x2116   :  { %1577 = vrot.lane.b32.xlu1 %v1575_v34, %s2556_s18 }
0x2188   :  { %v1578_v35 = vpop.permute.xlu1 %1577 }
0x2189   :  { %2112 = vmatmul.mubr.msk.f32.vlgmr.msra.gmra.mrb[20].mxu1 %vm151_vm1, %v1578_v35  ;;  %2132 = vmatmul.mubr.msk.f32.gmra.mrb[18].mxu0 %vm151_vm1, %v1578_v35 }
0x218a   :  { %2134 = vmatprep.mubr.msk.f32.mxu0 %vm2553_vm0, %v2554_v1 }
0x225c   :  { %v1647_v36 = vpop.f32.mrb[20].mxu1  ;;  %v1772_v38 = vpop.f32.mrb[18].mxu0 }
0x225d   :  { %v1648_v40 = vadd.f32 %v2897_v29, %v1647_v36  ;;  %v1773_v42 = vadd.f32 %v2943_v11, %v1772_v38  ;;  %v2113_v44 = vpop.f32.mrb[21].mxu1  ;;  %v2133_v43 = vpop.f32.mrb[19].mxu0 }
0x225f   :  { %2349 = vtanh.f32 %v1648_v40  ;;  %1784 = vst [vmem:[#allocation14 + $0x18] sm:$0xff] %v1773_v42  ;;  %v1842_v46 = vmul.f32 -1.442695, %v1648_v40 }
0x2261   :  { %2351 = vpow2.f32 %v1842_v46 }
0x2269   :  { %v2350_v45 = vpop.eup %2349 }
0x226a   :  { %1660 = vrot.lane.b32.xlu0 %v2350_v45, %s2555_s2 }
0x226b   :  { %v2352_v47 = vpop.eup %2351 }
0x226c   :  { %v1654_v48 = vadd.f32 1.0, %v2352_v47 }
0x226e   :  { %2353 = vrcp.f32 %v1654_v48 }
0x2278   :  { %v2354_v49 = vpop.eup %2353 }
0x2279   :  { %v1658_v29 = vmul.f32 %v2354_v49, %v1569_v30 }
0x22dc   :  { %v1661_v1 = vpop.permute.xlu0 %1660 }
0x22dd   :  { %v1663_v50 = vmul.f32 %v2354_v49, %v1661_v1 }
0x22df   :  { %1665 = vrot.lane.b32.xlu1 %v1663_v50, %s2556_s18 }
0x2351   :  { %v1666_v51 = vpop.permute.xlu1 %1665 }
0x2352   :  { %v1668_v52 = vadd.f32 %v1666_v51, %v1658_v29 }
0x2354   :  { %2355 = vtanh.f32 %v1668_v52 }
0x235e   :  { %v2356_v53 = vpop.eup %2355 }
0x235f   :  { %1671 = vrot.lane.b32.xlu0 %v2356_v53, %s2555_s2 }
0x23d1   :  { %v1672_v33 = vpop.permute.xlu0 %1671 }
0x23d2   :  { %v1674_v54 = vmul.f32 %v2354_v49, %v1672_v33 }
0x23d4   :  { %1687 = vrot.lane.b32.xlu1 %v1674_v54, %s2556_s18 }
0x2446   :  { %v1688_v55 = vpop.permute.xlu1 %1687 }
0x2447   :  { %2135 = vmatmul.mubr.msk.f32.gmra.mrb[20].mxu0 %vm151_vm1, %v1688_v55 }
0x251a   :  { %v1777_v56 = vpop.f32.mrb[20].mxu0 }
0x251b   :  { %v1778_v57 = vadd.f32 %v2943_v11, %v1777_v56  ;;  %v2136_v58 = vpop.f32.mrb[21].mxu0 }
0x251d   :  { %1785 = vst [vmem:[#allocation14 + $0x20] sm:$0xff] %v1778_v57 }
0x251e   :  { %2522 = shalt.err (!%p2519_p4)
}
0x251f   :  { %s2523_s21 = scalar_lea.hbm %s2990_s11, 640 }
0x2520   :  { %p2524_p5 = scmp.ne.s32.totalorder %s2990_s11, %s2523_s21  ;;  %p2527_p6 = scmp.lt.u32.totalorder %s2523_s21, %s2990_s11 }
0x2522   :  { %p2529_p7 = pnand %p2527_p6, %p2524_p5 }
0x2524   :  { %2532 = shalt.err (!%p2529_p7)
}
0x2525   :  { %1797 = dma.vmem_to_hbm [thread:$0]  %s1792_s17, 640, %s2990_s11, [#allocation4], %s2545_s29, %s2545_s29, %s2546_s30  }
0x2526   :  { %2541 = dma.done.wait [#allocation4], 640  }
0x2527   :  { %2542 = vsyncadd [#allocation4], 4294966656 }
0x2528   :  { %1801 = vsyncpa [#allocation3], 1 }
0x2529   :  { %1802 = vsyncpa [#allocation6], 1 }
0x252a   :  { %1803 = vsyncpa [#allocation9], 1 }
0x252b   :  { %1804 = vsyncpa [#allocation12], 1 }
0x252c   :  { %1805 = vsyncpa [#allocation4], 1 }

</bundles_post_ra>
